<compile_context>
chip_gen: v7x
topology: tpu7x:2x2x1
jax: 0.10.0
libtpu: 0.0.40
codegen_flags: <defaults>
</compile_context>

<pallas_src>
import functools

import jax
import jax.numpy as jnp
from jax.experimental import pallas as pl
from jax.experimental.pallas import tpu as pltpu


def _round_up(x, m):
    return (x + m - 1) // m * m


def _mask_head_kernel(x_ref, w1_ref, b1_ref, w2_ref, b2_ref, o_ref, *, Wp, TMc):
    # x_ref : (TM, Cin)      flattened padded pixels for tile_n whole ROIs
    # w1_ref: (9, Cin, Hidp) 3x3 conv taps (resident, constant index_map)
    # b1_ref: (1, Hidp) f32
    # w2_ref: (Hidp, NCp)    1x1 conv weights (resident)
    # b2_ref: (1, NCp)  f32
    # o_ref : (TM, NCp)      lane-dense output block (rows >= TMc are garbage)
    acc = None
    for kh in range(3):
        for kw in range(3):
            s = kh * Wp + kw                      # static row offset of this tap
            tap = x_ref[s:s + TMc, :]             # 2D contiguous slice, no reshape
            contrib = jnp.dot(tap, w1_ref[kh * 3 + kw],
                              preferred_element_type=jnp.float32)
            acc = contrib if acc is None else acc + contrib
    h = jnp.maximum(acc + b1_ref[...], 0.0)       # bias + ReLU in f32
    h = h.astype(w2_ref.dtype)
    out = jnp.dot(h, w2_ref[...], preferred_element_type=jnp.float32) + b2_ref[...]
    o_ref[0:TMc, :] = out.astype(o_ref.dtype)
    # Tail rows of the block never contain valid pixels; zero them so the
    # whole output block is defined.
    tail = o_ref.shape[0] - TMc
    o_ref[TMc:, :] = jnp.zeros((tail, o_ref.shape[1]), o_ref.dtype)


def mask_rcnn_predictor(x_nchw, w1, b1, w2, b2, *,
                        compute_dtype=jnp.bfloat16,
                        vmem_budget_bytes=12 * 1024 * 1024):
    """x_nchw: (N, Cin, H, W) f32; w1: (3,3,Cin,Hid) HWIO; w2: (Hid, Ncls).

    Returns (N, Ncls, H, W) f32, matching the PyTorch module's forward.
    """
    N, Cin, H, W = x_nchw.shape
    Hid = w1.shape[3]
    Ncls = w2.shape[1]
    Hp, Wp = H + 2, W + 2

    Hidp = _round_up(Hid, 128)                 # full-lane hidden width
    NCp = _round_up(Ncls, 128)                 # lane-dense output stores

    # Per-ROI flattened length L (rows):  Hp*Wp real padded pixels + zero tail.
    # E8 = halo rows a tap may reach past the compute range (rounded to 8).
    E8 = _round_up(2 * Wp + 2, 8)
    L = _round_up(max(Hp * Wp, (H - 1) * Wp + W + E8), 8)

    # ---- tile sizing (VMEM budget; conservative enough for v5e's 16 MiB
    #      default scoped VMEM and v7x's 64 MiB physical VMEM) ----
    in_bytes = jnp.dtype(compute_dtype).itemsize
    per_roi = L * (2 * Cin * in_bytes          # double-buffered input block
                   + 2 * NCp * 4               # double-buffered output block
                   + 2 * Hidp * 4              # f32 accumulator + hidden intermediate
                   + Cin * in_bytes)           # tap slice copy
    resident = 2 * (9 * Cin * Hidp * in_bytes + Hidp * NCp * in_bytes
                    + Hidp * 4 + NCp * 4)
    budget = max(1 << 20, vmem_budget_bytes - resident)
    tile_n = max(1, int(budget // max(per_roi, 1)))
    if N >= 2:
        # >= 2 grid steps so the "parallel" axis can shard across v7x's 2 TCs.
        tile_n = min(tile_n, -(-N // 2))
    tile_n = min(tile_n, N)
    N_pad = _round_up(N, tile_n)
    TM = tile_n * L                            # rows per block (multiple of 8)
    TMc = TM - E8                              # rows actually computed per block

    # ---- layout plumbing (XLA glue outside the kernel) ----
    x_nhwc = jnp.transpose(x_nchw, (0, 2, 3, 1))
    xpad = jnp.pad(x_nhwc, ((0, N_pad - N), (1, 1), (1, 1), (0, 0)))
    xflat = xpad.reshape(N_pad, Hp * Wp, Cin)
    xflat = jnp.pad(xflat, ((0, 0), (0, L - Hp * Wp), (0, 0)))
    xflat = xflat.reshape(N_pad * L, Cin).astype(compute_dtype)

    w1p = jnp.pad(w1.reshape(9, Cin, Hid),
                  ((0, 0), (0, 0), (0, Hidp - Hid))).astype(compute_dtype)
    b1p = jnp.pad(b1, ((0, Hidp - Hid),)).reshape(1, Hidp).astype(jnp.float32)
    w2p = jnp.pad(w2, ((0, Hidp - Hid), (0, NCp - Ncls))).astype(compute_dtype)
    b2p = jnp.pad(b2, ((0, NCp - Ncls),)).reshape(1, NCp).astype(jnp.float32)

    grid = (N_pad // tile_n,)
    m_eff = N_pad * L
    flops = 2 * m_eff * 9 * Cin * Hidp + 2 * m_eff * Hidp * NCp
    bytes_accessed = (m_eff * Cin * in_bytes + m_eff * NCp * 4
                      + 9 * Cin * Hidp * in_bytes + Hidp * NCp * in_bytes
                      + (Hidp + NCp) * 4)

    kernel = functools.partial(_mask_head_kernel, Wp=Wp, TMc=TMc)
    y = pl.pallas_call(
        kernel,
        out_shape=jax.ShapeDtypeStruct((N_pad * L, NCp), jnp.float32),
        grid=grid,
        in_specs=[
            pl.BlockSpec((TM, Cin), lambda i: (i, 0)),        # streamed pixels
            pl.BlockSpec((9, Cin, Hidp), lambda i: (0, 0, 0)),  # resident 3x3 taps
            pl.BlockSpec((1, Hidp), lambda i: (0, 0)),        # resident bias 1
            pl.BlockSpec((Hidp, NCp), lambda i: (0, 0)),      # resident 1x1 weights
            pl.BlockSpec((1, NCp), lambda i: (0, 0)),         # resident bias 2
        ],
        out_specs=pl.BlockSpec((TM, NCp), lambda i: (i, 0)),
        compiler_params=pltpu.CompilerParams(
            dimension_semantics=("parallel",)),
        cost_estimate=pl.CostEstimate(
            flops=int(flops), transcendentals=0,
            bytes_accessed=int(bytes_accessed)),
    )(xflat, w1p, b1p, w2p, b2p)

    # Strip pad ROIs / pad pixels / pad classes, back to NCHW.
    y = y.reshape(N_pad, L, NCp)[:N, :Hp * Wp, :]
    y = y.reshape(N, Hp, Wp, NCp)[:, :H, :W, :Ncls]
    return jnp.transpose(y, (0, 3, 1, 2))


def _reference(x_nchw, w1, b1, w2, b2):
    """Pure-JAX reference (lax conv) for correctness check."""
    x = jnp.transpose(x_nchw, (0, 2, 3, 1))
    dn = ("NHWC", "HWIO", "NHWC")
    h = jax.lax.conv_general_dilated(x, w1, (1, 1), "SAME", dimension_numbers=dn)
    h = jnp.maximum(h + b1, 0.0)
    Hid, Ncls = w2.shape
    o = jax.lax.conv_general_dilated(
        h, w2.reshape(1, 1, Hid, Ncls), (1, 1), "SAME", dimension_numbers=dn)
    o = o + b2
    return jnp.transpose(o, (0, 3, 1, 2))


if __name__ == "__main__":
    # Small, deterministic shapes consistent with the module's forward.
    N, Cin, H, W = 2, 4, 16, 16
    Hid, Ncls = 32, 3

    key = jax.random.PRNGKey(0)
    kx, k1, k2, k3, k4 = jax.random.split(key, 5)

    x = jax.random.normal(kx, (N, Cin, H, W), jnp.float32)
    # Parameters (deterministic synthetic init; HWIO for conv1, IO for conv2).
    w1 = jax.random.normal(k1, (3, 3, Cin, Hid), jnp.float32) * 0.1
    b1 = jax.random.normal(k2, (Hid,), jnp.float32) * 0.1
    w2 = jax.random.normal(k3, (Hid, Ncls), jnp.float32) * 0.1
    b2 = jax.random.normal(k4, (Ncls,), jnp.float32) * 0.1

    ref = jax.block_until_ready(_reference(x, w1, b1, w2, b2))

    # f32 path: exact structural check against the lax.conv reference.
    out_f32 = jax.block_until_ready(
        mask_rcnn_predictor(x, w1, b1, w2, b2, compute_dtype=jnp.float32))
    assert out_f32.shape == (N, Ncls, H, W)
    assert jnp.allclose(out_f32, ref, atol=1e-4, rtol=1e-4), "f32 mismatch vs reference"

    # bf16 path (default / performance config): looser tolerance, f32 accumulation.
    out_bf16 = jax.block_until_ready(mask_rcnn_predictor(x, w1, b1, w2, b2))
    assert out_bf16.shape == (N, Ncls, H, W)
    assert jnp.allclose(out_bf16, ref, atol=5e-2, rtol=5e-2), "bf16 mismatch vs reference"

    print("KERNEL_OK")
</pallas_src>

<mosaic_0001>
module attributes {stable_mosaic.version = 11 : i64} {
  func.func @_mask_head_kernel(%arg0: i32, %arg1: memref<328x4xf32, #tpu.memory_space<vmem>>, %arg2: memref<9x4x128xf32, #tpu.memory_space<vmem>>, %arg3: memref<1x128xf32, #tpu.memory_space<vmem>>, %arg4: memref<128x128xf32, #tpu.memory_space<vmem>>, %arg5: memref<1x128xf32, #tpu.memory_space<vmem>>, %arg6: memref<328x128xf32, #tpu.memory_space<vmem>>) attributes {dimension_semantics = [#tpu.dimension_semantics<parallel>], iteration_bounds = array<i64: 2>, scalar_prefetch = 0 : i64, scratch_operands = 0 : i64, tpu.core_type = #tpu.core_type<tc>, window_params = [{transform_indices = @transform_0, window_bounds = array<i64: 328, 4>}, {pipeline_mode = #tpu.pipeline_mode<synchronous>, transform_indices = @transform_1, window_bounds = array<i64: 9, 4, 128>}, {pipeline_mode = #tpu.pipeline_mode<synchronous>, transform_indices = @transform_2, window_bounds = array<i64: 1, 128>}, {pipeline_mode = #tpu.pipeline_mode<synchronous>, transform_indices = @transform_3, window_bounds = array<i64: 128, 128>}, {pipeline_mode = #tpu.pipeline_mode<synchronous>, transform_indices = @transform_4, window_bounds = array<i64: 1, 128>}, {transform_indices = @transform_5, window_bounds = array<i64: 328, 128>}]} {
    %c0 = arith.constant 0 : index
    %c0_0 = arith.constant 0 : index
    %0 = vector.load %arg1[%c0, %c0_0] : memref<328x4xf32, #tpu.memory_space<vmem>>, vector<288x4xf32>
    %c0_1 = arith.constant 0 : index
    %c0_2 = arith.constant 0 : index
    %c0_3 = arith.constant 0 : index
    %1 = vector.load %arg2[%c0_1, %c0_2, %c0_3] : memref<9x4x128xf32, #tpu.memory_space<vmem>>, vector<1x4x128xf32>
    %2 = vector.shape_cast %1 : vector<1x4x128xf32> to vector<4x128xf32>
    %cst = arith.constant dense<0.000000e+00> : vector<288x128xf32>
    %3 = tpu.matmul %0, %2, %cst {dimension_numbers = #tpu.dot_dimension_numbers<[1], [0], [0], [1], [0, 0, 1, 1], [], []>} : vector<288x4xf32>, vector<4x128xf32>, vector<288x128xf32> -> vector<288x128xf32>
    %c1 = arith.constant 1 : index
    %c0_4 = arith.constant 0 : index
    %4 = vector.load %arg1[%c1, %c0_4] : memref<328x4xf32, #tpu.memory_space<vmem>>, vector<288x4xf32>
    %c1_5 = arith.constant 1 : index
    %c0_6 = arith.constant 0 : index
    %c0_7 = arith.constant 0 : index
    %5 = vector.load %arg2[%c1_5, %c0_6, %c0_7] : memref<9x4x128xf32, #tpu.memory_space<vmem>>, vector<1x4x128xf32>
    %6 = vector.shape_cast %5 : vector<1x4x128xf32> to vector<4x128xf32>
    %cst_8 = arith.constant dense<0.000000e+00> : vector<288x128xf32>
    %7 = tpu.matmul %4, %6, %cst_8 {dimension_numbers = #tpu.dot_dimension_numbers<[1], [0], [0], [1], [0, 0, 1, 1], [], []>} : vector<288x4xf32>, vector<4x128xf32>, vector<288x128xf32> -> vector<288x128xf32>
    %8 = arith.addf %3, %7 : vector<288x128xf32>
    %c2 = arith.constant 2 : index
    %c0_9 = arith.constant 0 : index
    %9 = vector.load %arg1[%c2, %c0_9] : memref<328x4xf32, #tpu.memory_space<vmem>>, vector<288x4xf32>
    %c2_10 = arith.constant 2 : index
    %c0_11 = arith.constant 0 : index
    %c0_12 = arith.constant 0 : index
    %10 = vector.load %arg2[%c2_10, %c0_11, %c0_12] : memref<9x4x128xf32, #tpu.memory_space<vmem>>, vector<1x4x128xf32>
    %11 = vector.shape_cast %10 : vector<1x4x128xf32> to vector<4x128xf32>
    %cst_13 = arith.constant dense<0.000000e+00> : vector<288x128xf32>
    %12 = tpu.matmul %9, %11, %cst_13 {dimension_numbers = #tpu.dot_dimension_numbers<[1], [0], [0], [1], [0, 0, 1, 1], [], []>} : vector<288x4xf32>, vector<4x128xf32>, vector<288x128xf32> -> vector<288x128xf32>
    %13 = arith.addf %8, %12 : vector<288x128xf32>
    %c18 = arith.constant 18 : index
    %c0_14 = arith.constant 0 : index
    %14 = vector.load %arg1[%c18, %c0_14] : memref<328x4xf32, #tpu.memory_space<vmem>>, vector<288x4xf32>
    %c3 = arith.constant 3 : index
    %c0_15 = arith.constant 0 : index
    %c0_16 = arith.constant 0 : index
    %15 = vector.load %arg2[%c3, %c0_15, %c0_16] : memref<9x4x128xf32, #tpu.memory_space<vmem>>, vector<1x4x128xf32>
    %16 = vector.shape_cast %15 : vector<1x4x128xf32> to vector<4x128xf32>
    %cst_17 = arith.constant dense<0.000000e+00> : vector<288x128xf32>
    %17 = tpu.matmul %14, %16, %cst_17 {dimension_numbers = #tpu.dot_dimension_numbers<[1], [0], [0], [1], [0, 0, 1, 1], [], []>} : vector<288x4xf32>, vector<4x128xf32>, vector<288x128xf32> -> vector<288x128xf32>
    %18 = arith.addf %13, %17 : vector<288x128xf32>
    %c19 = arith.constant 19 : index
    %c0_18 = arith.constant 0 : index
    %19 = vector.load %arg1[%c19, %c0_18] : memref<328x4xf32, #tpu.memory_space<vmem>>, vector<288x4xf32>
    %c4 = arith.constant 4 : index
    %c0_19 = arith.constant 0 : index
    %c0_20 = arith.constant 0 : index
    %20 = vector.load %arg2[%c4, %c0_19, %c0_20] : memref<9x4x128xf32, #tpu.memory_space<vmem>>, vector<1x4x128xf32>
    %21 = vector.shape_cast %20 : vector<1x4x128xf32> to vector<4x128xf32>
    %cst_21 = arith.constant dense<0.000000e+00> : vector<288x128xf32>
    %22 = tpu.matmul %19, %21, %cst_21 {dimension_numbers = #tpu.dot_dimension_numbers<[1], [0], [0], [1], [0, 0, 1, 1], [], []>} : vector<288x4xf32>, vector<4x128xf32>, vector<288x128xf32> -> vector<288x128xf32>
    %23 = arith.addf %18, %22 : vector<288x128xf32>
    %c20 = arith.constant 20 : index
    %c0_22 = arith.constant 0 : index
    %24 = vector.load %arg1[%c20, %c0_22] : memref<328x4xf32, #tpu.memory_space<vmem>>, vector<288x4xf32>
    %c5 = arith.constant 5 : index
    %c0_23 = arith.constant 0 : index
    %c0_24 = arith.constant 0 : index
    %25 = vector.load %arg2[%c5, %c0_23, %c0_24] : memref<9x4x128xf32, #tpu.memory_space<vmem>>, vector<1x4x128xf32>
    %26 = vector.shape_cast %25 : vector<1x4x128xf32> to vector<4x128xf32>
    %cst_25 = arith.constant dense<0.000000e+00> : vector<288x128xf32>
    %27 = tpu.matmul %24, %26, %cst_25 {dimension_numbers = #tpu.dot_dimension_numbers<[1], [0], [0], [1], [0, 0, 1, 1], [], []>} : vector<288x4xf32>, vector<4x128xf32>, vector<288x128xf32> -> vector<288x128xf32>
    %28 = arith.addf %23, %27 : vector<288x128xf32>
    %c36 = arith.constant 36 : index
    %c0_26 = arith.constant 0 : index
    %29 = vector.load %arg1[%c36, %c0_26] : memref<328x4xf32, #tpu.memory_space<vmem>>, vector<288x4xf32>
    %c6 = arith.constant 6 : index
    %c0_27 = arith.constant 0 : index
    %c0_28 = arith.constant 0 : index
    %30 = vector.load %arg2[%c6, %c0_27, %c0_28] : memref<9x4x128xf32, #tpu.memory_space<vmem>>, vector<1x4x128xf32>
    %31 = vector.shape_cast %30 : vector<1x4x128xf32> to vector<4x128xf32>
    %cst_29 = arith.constant dense<0.000000e+00> : vector<288x128xf32>
    %32 = tpu.matmul %29, %31, %cst_29 {dimension_numbers = #tpu.dot_dimension_numbers<[1], [0], [0], [1], [0, 0, 1, 1], [], []>} : vector<288x4xf32>, vector<4x128xf32>, vector<288x128xf32> -> vector<288x128xf32>
    %33 = arith.addf %28, %32 : vector<288x128xf32>
    %c37 = arith.constant 37 : index
    %c0_30 = arith.constant 0 : index
    %34 = vector.load %arg1[%c37, %c0_30] : memref<328x4xf32, #tpu.memory_space<vmem>>, vector<288x4xf32>
    %c7 = arith.constant 7 : index
    %c0_31 = arith.constant 0 : index
    %c0_32 = arith.constant 0 : index
    %35 = vector.load %arg2[%c7, %c0_31, %c0_32] : memref<9x4x128xf32, #tpu.memory_space<vmem>>, vector<1x4x128xf32>
    %36 = vector.shape_cast %35 : vector<1x4x128xf32> to vector<4x128xf32>
    %cst_33 = arith.constant dense<0.000000e+00> : vector<288x128xf32>
    %37 = tpu.matmul %34, %36, %cst_33 {dimension_numbers = #tpu.dot_dimension_numbers<[1], [0], [0], [1], [0, 0, 1, 1], [], []>} : vector<288x4xf32>, vector<4x128xf32>, vector<288x128xf32> -> vector<288x128xf32>
    %38 = arith.addf %33, %37 : vector<288x128xf32>
    %c38 = arith.constant 38 : index
    %c0_34 = arith.constant 0 : index
    %39 = vector.load %arg1[%c38, %c0_34] : memref<328x4xf32, #tpu.memory_space<vmem>>, vector<288x4xf32>
    %c8 = arith.constant 8 : index
    %c0_35 = arith.constant 0 : index
    %c0_36 = arith.constant 0 : index
    %40 = vector.load %arg2[%c8, %c0_35, %c0_36] : memref<9x4x128xf32, #tpu.memory_space<vmem>>, vector<1x4x128xf32>
    %41 = vector.shape_cast %40 : vector<1x4x128xf32> to vector<4x128xf32>
    %cst_37 = arith.constant dense<0.000000e+00> : vector<288x128xf32>
    %42 = tpu.matmul %39, %41, %cst_37 {dimension_numbers = #tpu.dot_dimension_numbers<[1], [0], [0], [1], [0, 0, 1, 1], [], []>} : vector<288x4xf32>, vector<4x128xf32>, vector<288x128xf32> -> vector<288x128xf32>
    %43 = arith.addf %38, %42 : vector<288x128xf32>
    %c0_38 = arith.constant 0 : index
    %c0_39 = arith.constant 0 : index
    %44 = vector.load %arg3[%c0_38, %c0_39] : memref<1x128xf32, #tpu.memory_space<vmem>>, vector<1x128xf32>
    %45 = vector.broadcast %44 : vector<1x128xf32> to vector<288x128xf32>
    %46 = arith.addf %43, %45 : vector<288x128xf32>
    %cst_40 = arith.constant 0.000000e+00 : f32
    %47 = vector.broadcast %cst_40 : f32 to vector<288x128xf32>
    %48 = arith.maximumf %46, %47 : vector<288x128xf32>
    %c0_41 = arith.constant 0 : index
    %c0_42 = arith.constant 0 : index
    %49 = vector.load %arg4[%c0_41, %c0_42] : memref<128x128xf32, #tpu.memory_space<vmem>>, vector<128x128xf32>
    %cst_43 = arith.constant dense<0.000000e+00> : vector<288x128xf32>
    %50 = tpu.matmul %48, %49, %cst_43 {dimension_numbers = #tpu.dot_dimension_numbers<[1], [0], [0], [1], [0, 0, 1, 1], [], []>} : vector<288x128xf32>, vector<128x128xf32>, vector<288x128xf32> -> vector<288x128xf32>
    %c0_44 = arith.constant 0 : index
    %c0_45 = arith.constant 0 : index
    %51 = vector.load %arg5[%c0_44, %c0_45] : memref<1x128xf32, #tpu.memory_space<vmem>>, vector<1x128xf32>
    %52 = vector.broadcast %51 : vector<1x128xf32> to vector<288x128xf32>
    %53 = arith.addf %50, %52 : vector<288x128xf32>
    %c0_46 = arith.constant 0 : index
    %c0_47 = arith.constant 0 : index
    %54 = vector.load %arg6[%c0_46, %c0_47] : memref<328x128xf32, #tpu.memory_space<vmem>>, vector<288x128xf32>
    tpu.vector_store %arg6[%c0_46, %c0_47], %53 {strides = array<i32>} : memref<328x128xf32, #tpu.memory_space<vmem>>, vector<288x128xf32>,
    %cst_48 = arith.constant 0.000000e+00 : f32
    %55 = vector.broadcast %cst_48 : f32 to vector<40x128xf32>
    %c288 = arith.constant 288 : index
    %c0_49 = arith.constant 0 : index
    %56 = vector.load %arg6[%c288, %c0_49] : memref<328x128xf32, #tpu.memory_space<vmem>>, vector<40x128xf32>
    tpu.vector_store %arg6[%c288, %c0_49], %55 {strides = array<i32>} : memref<328x128xf32, #tpu.memory_space<vmem>>, vector<40x128xf32>,
    return
  }
  func.func @transform_0(%arg0: i32) -> (i32, i32) {
    %c0_i32 = arith.constant 0 : i32
    %c0_i32_0 = arith.constant 0 : i32
    return %arg0, %c0_i32 : i32, i32
  }
  func.func @transform_1(%arg0: i32) -> (i32, i32, i32) {
    %c0_i32 = arith.constant 0 : i32
    %c0_i32_0 = arith.constant 0 : i32
    %c0_i32_1 = arith.constant 0 : i32
    %c0_i32_2 = arith.constant 0 : i32
    return %c0_i32, %c0_i32_0, %c0_i32_1 : i32, i32, i32
  }
  func.func @transform_2(%arg0: i32) -> (i32, i32) {
    %c0_i32 = arith.constant 0 : i32
    %c0_i32_0 = arith.constant 0 : i32
    %c0_i32_1 = arith.constant 0 : i32
    return %c0_i32, %c0_i32_0 : i32, i32
  }
  func.func @transform_3(%arg0: i32) -> (i32, i32) {
    %c0_i32 = arith.constant 0 : i32
    %c0_i32_0 = arith.constant 0 : i32
    %c0_i32_1 = arith.constant 0 : i32
    return %c0_i32, %c0_i32_0 : i32, i32
  }
  func.func @transform_4(%arg0: i32) -> (i32, i32) {
    %c0_i32 = arith.constant 0 : i32
    %c0_i32_0 = arith.constant 0 : i32
    %c0_i32_1 = arith.constant 0 : i32
    return %c0_i32, %c0_i32_0 : i32, i32
  }
  func.func @transform_5(%arg0: i32) -> (i32, i32) {
    %c0_i32 = arith.constant 0 : i32
    %c0_i32_0 = arith.constant 0 : i32
    return %arg0, %c0_i32 : i32, i32
  }
}

</mosaic_0001>

<bundles_post_ra>
// kernel: tpu_custom_call.1
= control target key start
LH: loop header
LB: loop body
LE: loop exit
PB: predicated region body
PF: predicated region fallthrough
CT: control target
= control target key end

     0   :  { %10 = vsyncpa [#allocation3], 0  ;;  %s7556_s0 = inlined_call_operand.vmem [shape: f32[656,4], index: 0, kind: input, shape index: {}]   ;;  %s7557_s1 = inlined_call_operand.vmem [shape: f32[9,4,128], index: 1, kind: input, shape index: {}]   ;;  %s7558_s2 = inlined_call_operand.vmem [shape: f32[1,128], index: 2, kind: input, shape index: {}]   ;;  %s7559_s3 = inlined_call_operand.vmem [shape: f32[128,128], index: 3, kind: input, shape index: {}]   ;;  %s7560_s4 = inlined_call_operand.vmem [shape: f32[1,128], index: 4, kind: input, shape index: {}]   ;;  %s7561_s5 = inlined_call_operand.hbm [shape: f32[656,128], index: 5, kind: output, shape index: {}]  }
   0x1   :  { %12 = vsyncpa [#allocation3 + $0x1], 0  ;;  %s6277_s18 = smov 0   ;;  %s6279_s19 = smov 0  }
   0x2   :  { %s6281_s20 = smov 0   ;;  %s6283_s21 = smov 0  }
   0x3 LB: > { %s6298_s22 = sadd.s32 4294967295, %s6241_s21   ;;  %s4489_s23 = sadd.s32 4294967294, %s6241_s21   ;;  %s6241_s21 = sphi %s6283_s21, %s7567_s21   ;;  %s6237_s20 = sphi %s6281_s20, %s7566_s20   ;;  %s6233_s19 = sphi %s6279_s19, %s7565_s19   ;;  %s6229_s18 = sphi %s6277_s18, %s7564_s18  }
   0x4   : > { %s6302_s24 = sadd.s32 1, %s6241_s21   ;;  %s135_s25 = sadd.s32 1, %s6237_s20 }
   0x5   : > { %s132_s26 = ssub.s32 %s6241_s21, %s6302_s24  ;;  %p145_p0 = scmp.ne.s32.totalorder %s6237_s20, %s6233_s19 }
   0x6   : > { %p133_p1 = scmp.eq.s32.totalorder %s132_s26, 0  ;;  %p146_p2 = scmp.eq.s32.totalorder %s6298_s22, 1 }
   0x7   : > { %p151_p3 = scmp.ne.s32.totalorder %s6233_s19, %s6229_s18  ;;  %p152_p4 = scmp.eq.s32.totalorder %s4489_s23, 1 }
   0x8   : > { %s6313_s27 = scalar_select %p133_p1, %s6237_s20, %s135_s25  }
   0x9   : > { %p6315_p5 = por %p146_p2, %p145_p0  ;;  %p6319_p6 = por %p152_p4, %p151_p3 }
   0xa   : > { %p4492_p7 = scmp.ge.s32.totalorder %s6241_s21, 1  ;;  %p191_p8 = scmp.lt.s32.totalorder %s6241_s21, 3 }
   0xc   : > { %p192_p9 = pnand %p4492_p7, %p191_p8 }
   0xd   : > { %vm410_vm0 = vcmask (!%p192_p9), 1043456   ;;  %v4645_v0 = vld [vmem:[%s7557_s1 + $0x10] sm:$0xf] (!%p192_p9)  ;;  %v4494_v1 = vld [vmem:[%s7557_s1 + $0x4] sm:$0xf] (!%p192_p9)  ;;  %s219_s9 = smul.u32 (!%p192_p9), 41, %s6298_s22 }
   0xe   : > { %195 = sbr.rel (%p192_p9) target bundleno = 832 (0x340), region = 40  ;;  %5450 = vmatprep.subr.msk.mxu0 (!%p192_p9), %vm410_vm0, %v4645_v0  ;;  %5226 = vmatprep.subr.msk.mxu1 (!%p192_p9), %vm410_vm0, %v4494_v1  ;;  %v4683_v2 = vld [vmem:[%s7557_s1 + $0x14] sm:$0xf] (!%p192_p9)  ;;  %v262_v3 = vld [vmem:[%s7557_s1] sm:$0xf] (!%p192_p9)  ;;  %vm301_vm1 = vcmask (!%p192_p9), 31744  }
   0xf   : > { %5451 = vmatpush3.msk.msra.mxu0 (!%p192_p9), %vm410_vm0, %v4645_v0  ;;  %5227 = vmatpush3.msk.msra.mxu1 (!%p192_p9), %vm410_vm0, %v4494_v1  ;;  %p220_p10 = scmp.lt.s32.totalorder (!%p192_p9), %s219_s9, 81  ;;  %v6362_v10 = vld [vmem:[%s7557_s1 + $0x18] sm:$0xf] (!%p192_p9)  ;;  %v4569_v59 = vld [vmem:[%s7557_s1 + $0x8] sm:$0xf] (!%p192_p9)  ;;  %s216_s15 = sand.u32 (!%p192_p9), 1, %s6233_s19  }
  0x10   : > { %5506 = vmatprep.subr.msk.mxu0 (!%p192_p9), %vm410_vm0, %v4683_v2  ;;  %5282 = vmatprep.subr.msk.mxu1 (!%p192_p9), %vm410_vm0, %v262_v3  ;;  %s6136_s16 = smul.u32 (!%p192_p9), 328, %s216_s15  ;;  %s6244_s11 = smov (!%p192_p9), [#allocation2]  }
  0x11   : > { %s4840_s30 = smul.u32 (!%p192_p9), 5248, %s6298_s22  ;;  %s7515_s22 = scalar_lea.sflag (!%p192_p9), [#allocation3], %s216_s15 }
  0x12   : > { %s7420_s23 = scalar_lea.vmem (!%p192_p9), [#allocation2], %s6136_s16 }
  0x13   : > { %s4427_s6 = sshll.u32 (!%p192_p9), %s7420_s23, 4  ;;  %s7508_s6 = int_to_ptr.vmem [resolvable:$true] %s4427_s6 }
  0x14   : > { %s6179_s10 = scalar_lea.vmem (!%p192_p9), %s7508_s6, 5248 }
  0x15   : > { %s7569_s9 = smov (!%p220_p10, %s219_s9), 81  ;;  %p6180_p11 = scmp.ne.s32.totalorder %s7508_s6, %s6179_s10 }
  0x16   : > { %s4493_s14 = sshll.u32 %s7569_s9, 3  ;;  %s7506_s9 = scalar_lea.hbm %s7561_s5, %s4840_s30 }
  0x17   : > { %s6347_s17 = scalar_lea.vmem %s7556_s0, %s4493_s14  ;;  %p6181_p12 = pnand %p6180_p11, %p6315_p5 }
  0x18   : > { %v263_v4 = vld [vmem:[%s6347_s17 + $0x1] sm:$0xff]  ;;  %v1875_v5 = vld [vmem:[%s6347_s17 + $0x13] sm:$0xff]  ;;  %v264_v6 = vld [vmem:[%s6347_s17 + $0x9] sm:$0xff] }
  0x19   : > { %5228 = vmatprep.mubr.msk.f32.mxu1 %vm301_vm1, %v263_v4  ;;  %5452 = vmatprep.mubr.msk.f32.mxu0 %vm301_vm1, %v1875_v5  ;;  %v1876_v7 = vld [vmem:[%s6347_s17 + $0x1b] sm:$0xff]  ;;  %v265_v8 = vld [vmem:[%s6347_s17 + $0x11] sm:$0xff]  ;;  %v1877_v9 = vld [vmem:[%s6347_s17 + $0x23] sm:$0xff]  ;;  %p6182_p13 = pneg %p6181_p12 }
  0x1a   : > { %5229 = vmatmul.mubr.msk.f32.vlgmr.msra.gmra.mrb[0].mxu1 %vm301_vm1, %v264_v6  ;;  %5453 = vmatmul.mubr.msk.f32.vlgmr.msra.gmra.mrb[0].mxu0 %vm301_vm1, %v1876_v7  ;;  %v266_v11 = vld [vmem:[%s6347_s17 + $0x19] sm:$0xff]  ;;  %v1878_v12 = vld [vmem:[%s6347_s17 + $0x2b] sm:$0xff]  ;;  %v267_v13 = vld [vmem:[%s6347_s17 + $0x21] sm:$0xff] }
  0x1b   : > { %5507 = vmatpush3.msk.msra.mxu0 %vm410_vm0, %v4683_v2  ;;  %5231 = vmatprep.mubr.msk.f32.mxu1 %vm301_vm1, %v265_v8  ;;  %v1879_v14 = vld [vmem:[%s6347_s17 + $0x33] sm:$0xff]  ;;  %v268_v15 = vld [vmem:[%s6347_s17 + $0x29] sm:$0xff]  ;;  %v1880_v16 = vld [vmem:[%s6347_s17 + $0x3b] sm:$0xff] }
  0x1c   : > { %5455 = vmatprep.mubr.msk.f32.mxu0 %vm301_vm1, %v1877_v9  ;;  %5283 = vmatpush3.msk.msra.mxu1 %vm410_vm0, %v262_v3  ;;  %v269_v17 = vld [vmem:[%s6347_s17 + $0x31] sm:$0xff]  ;;  %v1881_v18 = vld [vmem:[%s6347_s17 + $0x43] sm:$0xff]  ;;  %v270_v19 = vld [vmem:[%s6347_s17 + $0x39] sm:$0xff] }
  0x1d   : > { %5562 = vmatprep.subr.msk.mxu0 %vm410_vm0, %v6362_v10  ;;  %v1882_v20 = vld [vmem:[%s6347_s17 + $0x4b] sm:$0xff]  ;;  %v271_v21 = vld [vmem:[%s6347_s17 + $0x41] sm:$0xff]  ;;  %v1883_v22 = vld [vmem:[%s6347_s17 + $0x53] sm:$0xff]  ;;  %5338 = vmatprep.subr.msk.mxu1 %vm410_vm0, %v4569_v59 }
  0x1e   : > { %5232 = vmatmul.mubr.msk.f32.gmra.mrb[2].mxu1 %vm301_vm1, %v266_v11  ;;  %5456 = vmatmul.mubr.msk.f32.gmra.mrb[2].mxu0 %vm301_vm1, %v1878_v12  ;;  %v272_v23 = vld [vmem:[%s6347_s17 + $0x49] sm:$0xff]  ;;  %v1884_v24 = vld [vmem:[%s6347_s17 + $0x5b] sm:$0xff]  ;;  %v273_v25 = vld [vmem:[%s6347_s17 + $0x51] sm:$0xff] }
  0x1f   : > { %5234 = vmatprep.mubr.msk.f32.mxu1 %vm301_vm1, %v267_v13  ;;  %5458 = vmatprep.mubr.msk.f32.mxu0 %vm301_vm1, %v1879_v14  ;;  %v1885_v26 = vld [vmem:[%s6347_s17 + $0x63] sm:$0xff]  ;;  %v274_v27 = vld [vmem:[%s6347_s17 + $0x59] sm:$0xff]  ;;  %v1886_v28 = vld [vmem:[%s6347_s17 + $0x6b] sm:$0xff] }
  0x20   : > { %v275_v29 = vld [vmem:[%s6347_s17 + $0x61] sm:$0xff]  ;;  %v1887_v30 = vld [vmem:[%s6347_s17 + $0x73] sm:$0xff]  ;;  %v276_v31 = vld [vmem:[%s6347_s17 + $0x69] sm:$0xff] }
  0x21   : > { %v1888_v32 = vld [vmem:[%s6347_s17 + $0x7b] sm:$0xff]  ;;  %v277_v33 = vld [vmem:[%s6347_s17 + $0x71] sm:$0xff]  ;;  %v1889_v34 = vld [vmem:[%s6347_s17 + $0x83] sm:$0xff] }
  0x22   : > { %5235 = vmatmul.mubr.msk.f32.gmra.mrb[4].mxu1 %vm301_vm1, %v268_v15  ;;  %5459 = vmatmul.mubr.msk.f32.gmra.mrb[4].mxu0 %vm301_vm1, %v1880_v16  ;;  %v278_v35 = vld [vmem:[%s6347_s17 + $0x79] sm:$0xff]  ;;  %v1890_v36 = vld [vmem:[%s6347_s17 + $0x8b] sm:$0xff]  ;;  %v279_v37 = vld [vmem:[%s6347_s17 + $0x81] sm:$0xff] }
  0x23   : > { %5237 = vmatprep.mubr.msk.f32.mxu1 %vm301_vm1, %v269_v17  ;;  %5461 = vmatprep.mubr.msk.f32.mxu0 %vm301_vm1, %v1881_v18  ;;  %v1891_v38 = vld [vmem:[%s6347_s17 + $0x93] sm:$0xff]  ;;  %v280_v39 = vld [vmem:[%s6347_s17 + $0x89] sm:$0xff]  ;;  %v1892_v40 = vld [vmem:[%s6347_s17 + $0x9b] sm:$0xff] }
  0x24   : > { %v281_v41 = vld [vmem:[%s6347_s17 + $0x91] sm:$0xff]  ;;  %v1893_v42 = vld [vmem:[%s6347_s17 + $0xa3] sm:$0xff]  ;;  %v282_v43 = vld [vmem:[%s6347_s17 + $0x99] sm:$0xff] }
  0x25   : > { %v1894_v44 = vld [vmem:[%s6347_s17 + $0xab] sm:$0xff]  ;;  %v283_v45 = vld [vmem:[%s6347_s17 + $0xa1] sm:$0xff]  ;;  %v1895_v46 = vld [vmem:[%s6347_s17 + $0xb3] sm:$0xff] }
  0x26   : > { %5238 = vmatmul.mubr.msk.f32.gmra.mrb[6].mxu1 %vm301_vm1, %v270_v19  ;;  %5462 = vmatmul.mubr.msk.f32.gmra.mrb[6].mxu0 %vm301_vm1, %v1882_v20  ;;  %v284_v47 = vld [vmem:[%s6347_s17 + $0xa9] sm:$0xff]  ;;  %v1896_v48 = vld [vmem:[%s6347_s17 + $0xbb] sm:$0xff]  ;;  %v285_v49 = vld [vmem:[%s6347_s17 + $0xb1] sm:$0xff] }
  0x27   : > { %5240 = vmatprep.mubr.msk.f32.mxu1 %vm301_vm1, %v271_v21  ;;  %5464 = vmatprep.mubr.msk.f32.mxu0 %vm301_vm1, %v1883_v22  ;;  %v1897_v50 = vld [vmem:[%s6347_s17 + $0xc3] sm:$0xff]  ;;  %v286_v51 = vld [vmem:[%s6347_s17 + $0xb9] sm:$0xff]  ;;  %v1898_v52 = vld [vmem:[%s6347_s17 + $0xcb] sm:$0xff] }
  0x28   : > { %v287_v53 = vld [vmem:[%s6347_s17 + $0xc1] sm:$0xff]  ;;  %v1899_v54 = vld [vmem:[%s6347_s17 + $0xd3] sm:$0xff]  ;;  %v288_v55 = vld [vmem:[%s6347_s17 + $0xc9] sm:$0xff] }
  0x29   : > { %v1900_v56 = vld [vmem:[%s6347_s17 + $0xdb] sm:$0xff]  ;;  %v289_v57 = vld [vmem:[%s6347_s17 + $0xd1] sm:$0xff]  ;;  %v1901_v58 = vld [vmem:[%s6347_s17 + $0xe3] sm:$0xff] }
  0x2a   : > { %5241 = vmatmul.mubr.msk.f32.gmra.mrb[8].mxu1 %vm301_vm1, %v272_v23  ;;  %5465 = vmatmul.mubr.msk.f32.gmra.mrb[8].mxu0 %vm301_vm1, %v1884_v24  ;;  %v290_v60 = vld [vmem:[%s6347_s17 + $0xd9] sm:$0xff]  ;;  %v1902_v61 = vld [vmem:[%s6347_s17 + $0xeb] sm:$0xff]  ;;  %v291_v62 = vld [vmem:[%s6347_s17 + $0xe1] sm:$0xff] }
  0x2b   : > { %5243 = vmatprep.mubr.msk.f32.mxu1 %vm301_vm1, %v273_v25  ;;  %5467 = vmatprep.mubr.msk.f32.mxu0 %vm301_vm1, %v1885_v26  ;;  %v1903_v63 = vld [vmem:[%s6347_s17 + $0xf3] sm:$0xff]  ;;  %v292_v0 = vld [vmem:[%s6347_s17 + $0xe9] sm:$0xff]  ;;  %v1904_v1 = vld [vmem:[%s6347_s17 + $0xfb] sm:$0xff] }
  0x2c   : > { %v293_v2 = vld [vmem:[%s6347_s17 + $0xf1] sm:$0xff]  ;;  %v1905_v3 = vld [vmem:[%s6347_s17 + $0x103] sm:$0xff]  ;;  %v294_v4 = vld [vmem:[%s6347_s17 + $0xf9] sm:$0xff] }
  0x2d   : > { %v1906_v5 = vld [vmem:[%s6347_s17 + $0x10b] sm:$0xff]  ;;  %v295_v6 = vld [vmem:[%s6347_s17 + $0x101] sm:$0xff]  ;;  %v1907_v7 = vld [vmem:[%s6347_s17 + $0x113] sm:$0xff] }
  0x2e   : > { %5244 = vmatmul.mubr.msk.f32.gmra.mrb[10].mxu1 %vm301_vm1, %v274_v27  ;;  %5468 = vmatmul.mubr.msk.f32.gmra.mrb[10].mxu0 %vm301_vm1, %v1886_v28  ;;  %v296_v8 = vld [vmem:[%s6347_s17 + $0x109] sm:$0xff]  ;;  %v1908_v9 = vld [vmem:[%s6347_s17 + $0x11b] sm:$0xff]  ;;  %v297_v11 = vld [vmem:[%s6347_s17 + $0x111] sm:$0xff] }
  0x2f   : > { %5246 = vmatprep.mubr.msk.f32.mxu1 %vm301_vm1, %v275_v29  ;;  %5470 = vmatprep.mubr.msk.f32.mxu0 %vm301_vm1, %v1887_v30  ;;  %v1909_v12 = vld [vmem:[%s6347_s17 + $0x123] sm:$0xff]  ;;  %v298_v13 = vld [vmem:[%s6347_s17 + $0x119] sm:$0xff]  ;;  %v1910_v14 = vld [vmem:[%s6347_s17 + $0x12b] sm:$0xff] }
  0x30   : > { %v226_v15 = vld [vmem:[%s6347_s17] sm:$0xff]  ;;  %v2305_v16 = vld [vmem:[%s6347_s17 + $0x14] sm:$0xff]  ;;  %v227_v17 = vld [vmem:[%s6347_s17 + $0x8] sm:$0xff] }
  0x31   : > { %v2306_v18 = vld [vmem:[%s6347_s17 + $0x1c] sm:$0xff]  ;;  %v228_v19 = vld [vmem:[%s6347_s17 + $0x10] sm:$0xff]  ;;  %v6514_v20 = vld [vmem:[%s6347_s17 + $0x24] sm:$0xff] }
  0x32   : > { %5247 = vmatmul.mubr.msk.f32.gmra.mrb[12].mxu1 %vm301_vm1, %v276_v31  ;;  %5471 = vmatmul.mubr.msk.f32.gmra.mrb[12].mxu0 %vm301_vm1, %v1888_v32  ;;  %v6521_v21 = vld [vmem:[%s7557_s1 + $0x1c] sm:$0xf]  ;;  %v6528_v23 = vld [vmem:[%s6347_s17 + $0x2c] sm:$0xff]  ;;  %v230_v24 = vld [vmem:[%s6347_s17 + $0x20] sm:$0xff] }
  0x33   : > { %5249 = vmatprep.mubr.msk.f32.mxu1 %vm301_vm1, %v277_v33  ;;  %5473 = vmatprep.mubr.msk.f32.mxu0 %vm301_vm1, %v1889_v34  ;;  %v229_v22 = vld [vmem:[%s6347_s17 + $0x18] sm:$0xff]  ;;  %v232_v27 = vld [vmem:[%s6347_s17 + $0x30] sm:$0xff]  ;;  %v6551_v28 = vld [vmem:[%s6347_s17 + $0x44] sm:$0xff] }
  0x34   : > { %v6534_v25 = vld [vmem:[%s6347_s17 + $0x34] sm:$0xff]  ;;  %v6547_v26 = vld [vmem:[%s6347_s17 + $0x3c] sm:$0xff]  ;;  %v6561_v30 = vld [vmem:[%s6347_s17 + $0x4c] sm:$0xff] }
  0x35   : > { %v233_v29 = vld [vmem:[%s6347_s17 + $0x38] sm:$0xff]  ;;  %v234_v31 = vld [vmem:[%s6347_s17 + $0x40] sm:$0xff]  ;;  %v6573_v33 = vld [vmem:[%s7557_s1 + $0xc] sm:$0xf] }
  0x36   : > { %5250 = vmatmul.mubr.msk.f32.gmra.mrb[14].mxu1 %vm301_vm1, %v278_v35  ;;  %5474 = vmatmul.mubr.msk.f32.gmra.mrb[14].mxu0 %vm301_vm1, %v1890_v36  ;;  %v6565_v32 = vld [vmem:[%s6347_s17 + $0x54] sm:$0xff]  ;;  %v235_v34 = vld [vmem:[%s6347_s17 + $0x48] sm:$0xff]  ;;  %v6580_v35 = vld [vmem:[%s6347_s17 + $0x5c] sm:$0xff] }
  0x37   : > { %5252 = vmatprep.mubr.msk.f32.mxu1 %vm301_vm1, %v279_v37  ;;  %5476 = vmatprep.mubr.msk.f32.mxu0 %vm301_vm1, %v1891_v38  ;;  %v236_v36 = vld [vmem:[%s6347_s17 + $0x50] sm:$0xff]  ;;  %v6584_v37 = vld [vmem:[%s6347_s17 + $0x64] sm:$0xff]  ;;  %v237_v38 = vld [vmem:[%s6347_s17 + $0x58] sm:$0xff] }
  0x3a   : > { %5253 = vmatmul.mubr.msk.f32.gmra.mrb[16].mxu1 %vm301_vm1, %v280_v39  ;;  %5477 = vmatmul.mubr.msk.f32.gmra.mrb[16].mxu0 %vm301_vm1, %v1892_v40  ;;  %v6596_v39 = vld [vmem:[%s6347_s17 + $0x6c] sm:$0xff]  ;;  %v238_v40 = vld [vmem:[%s6347_s17 + $0x60] sm:$0xff] }
  0x3b   : > { %5255 = vmatprep.mubr.msk.f32.mxu1 %vm301_vm1, %v281_v41  ;;  %5479 = vmatprep.mubr.msk.f32.mxu0 %vm301_vm1, %v1893_v42  ;;  %v6600_v41 = vld [vmem:[%s6347_s17 + $0x74] sm:$0xff]  ;;  %v239_v42 = vld [vmem:[%s6347_s17 + $0x68] sm:$0xff] }
  0x3e   : > { %5256 = vmatmul.mubr.msk.f32.gmra.mrb[18].mxu1 %vm301_vm1, %v282_v43  ;;  %5480 = vmatmul.mubr.msk.f32.gmra.mrb[18].mxu0 %vm301_vm1, %v1894_v44  ;;  %v6610_v43 = vld [vmem:[%s6347_s17 + $0x7c] sm:$0xff]  ;;  %v240_v44 = vld [vmem:[%s6347_s17 + $0x70] sm:$0xff] }
  0x3f   : > { %5258 = vmatprep.mubr.msk.f32.mxu1 %vm301_vm1, %v283_v45  ;;  %5482 = vmatprep.mubr.msk.f32.mxu0 %vm301_vm1, %v1895_v46  ;;  %v6614_v45 = vld [vmem:[%s6347_s17 + $0x84] sm:$0xff]  ;;  %v241_v46 = vld [vmem:[%s6347_s17 + $0x78] sm:$0xff] }
  0x42   : > { %5259 = vmatmul.mubr.msk.f32.gmra.mrb[20].mxu1 %vm301_vm1, %v284_v47  ;;  %5483 = vmatmul.mubr.msk.f32.gmra.mrb[20].mxu0 %vm301_vm1, %v1896_v48  ;;  %v6624_v47 = vld [vmem:[%s6347_s17 + $0x8c] sm:$0xff]  ;;  %v242_v48 = vld [vmem:[%s6347_s17 + $0x80] sm:$0xff] }
  0x43   : > { %5261 = vmatprep.mubr.msk.f32.mxu1 %vm301_vm1, %v285_v49  ;;  %5485 = vmatprep.mubr.msk.f32.mxu0 %vm301_vm1, %v1897_v50  ;;  %v6628_v49 = vld [vmem:[%s6347_s17 + $0x94] sm:$0xff]  ;;  %v243_v50 = vld [vmem:[%s6347_s17 + $0x88] sm:$0xff] }
  0x46   : > { %5262 = vmatmul.mubr.msk.f32.gmra.mrb[22].mxu1 %vm301_vm1, %v286_v51  ;;  %5486 = vmatmul.mubr.msk.f32.gmra.mrb[22].mxu0 %vm301_vm1, %v1898_v52  ;;  %v6638_v51 = vld [vmem:[%s6347_s17 + $0x9c] sm:$0xff]  ;;  %v244_v52 = vld [vmem:[%s6347_s17 + $0x90] sm:$0xff] }
  0x47   : > { %5264 = vmatprep.mubr.msk.f32.mxu1 %vm301_vm1, %v287_v53  ;;  %5488 = vmatprep.mubr.msk.f32.mxu0 %vm301_vm1, %v1899_v54  ;;  %v6642_v53 = vld [vmem:[%s6347_s17 + $0xa4] sm:$0xff]  ;;  %v245_v54 = vld [vmem:[%s6347_s17 + $0x98] sm:$0xff] }
  0x4a   : > { %5265 = vmatmul.mubr.msk.f32.gmra.mrb[24].mxu1 %vm301_vm1, %v288_v55  ;;  %5489 = vmatmul.mubr.msk.f32.gmra.mrb[24].mxu0 %vm301_vm1, %v1900_v56  ;;  %v6652_v55 = vld [vmem:[%s6347_s17 + $0xac] sm:$0xff]  ;;  %v246_v56 = vld [vmem:[%s6347_s17 + $0xa0] sm:$0xff] }
  0x4b   : > { %5267 = vmatprep.mubr.msk.f32.mxu1 %vm301_vm1, %v289_v57  ;;  %5491 = vmatprep.mubr.msk.f32.mxu0 %vm301_vm1, %v1901_v58  ;;  %v6656_v57 = vld [vmem:[%s6347_s17 + $0xb4] sm:$0xff]  ;;  %v247_v58 = vld [vmem:[%s6347_s17 + $0xa8] sm:$0xff] }
  0x4e   : > { %5268 = vmatmul.mubr.msk.f32.gmra.mrb[26].mxu1 %vm301_vm1, %v290_v60  ;;  %5492 = vmatmul.mubr.msk.f32.gmra.mrb[26].mxu0 %vm301_vm1, %v1902_v61  ;;  %v248_v60 = vld [vmem:[%s6347_s17 + $0xb0] sm:$0xff]  ;;  %v6670_v61 = vld [vmem:[%s6347_s17 + $0xc4] sm:$0xff] }
  0x4f   : > { %5270 = vmatprep.mubr.msk.f32.mxu1 %vm301_vm1, %v291_v62  ;;  %5494 = vmatprep.mubr.msk.f32.mxu0 %vm301_vm1, %v1903_v63  ;;  %v249_v62 = vld [vmem:[%s6347_s17 + $0xb8] sm:$0xff]  ;;  %v6680_v63 = vld [vmem:[%s6347_s17 + $0xcc] sm:$0xff] }
  0x52   : > { %5271 = vmatmul.mubr.msk.f32.gmra.mrb[28].mxu1 %vm301_vm1, %v292_v0  ;;  %5495 = vmatmul.mubr.msk.f32.gmra.mrb[28].mxu0 %vm301_vm1, %v1904_v1  ;;  %v250_v0 = vld [vmem:[%s6347_s17 + $0xc0] sm:$0xff]  ;;  %v6684_v1 = vld [vmem:[%s6347_s17 + $0xd4] sm:$0xff] }
  0x53   : > { %5273 = vmatprep.mubr.msk.f32.mxu1 %vm301_vm1, %v293_v2  ;;  %5497 = vmatprep.mubr.msk.f32.mxu0 %vm301_vm1, %v1905_v3  ;;  %v251_v2 = vld [vmem:[%s6347_s17 + $0xc8] sm:$0xff]  ;;  %v6694_v3 = vld [vmem:[%s6347_s17 + $0xdc] sm:$0xff] }
  0x56   : > { %5274 = vmatmul.mubr.msk.f32.gmra.mrb[30].mxu1 %vm301_vm1, %v294_v4  ;;  %5498 = vmatmul.mubr.msk.f32.gmra.mrb[30].mxu0 %vm301_vm1, %v1906_v5  ;;  %v252_v4 = vld [vmem:[%s6347_s17 + $0xd0] sm:$0xff]  ;;  %v6698_v5 = vld [vmem:[%s6347_s17 + $0xe4] sm:$0xff] }
  0x57   : > { %5276 = vmatprep.mubr.msk.f32.mxu1 %vm301_vm1, %v295_v6  ;;  %5500 = vmatprep.mubr.msk.f32.mxu0 %vm301_vm1, %v1907_v7  ;;  %v253_v6 = vld [vmem:[%s6347_s17 + $0xd8] sm:$0xff]  ;;  %v6708_v7 = vld [vmem:[%s6347_s17 + $0xec] sm:$0xff] }
  0x5a   : > { %5277 = vmatmul.mubr.msk.f32.gmra.mrb[32].mxu1 %vm301_vm1, %v296_v8  ;;  %5501 = vmatmul.mubr.msk.f32.gmra.mrb[32].mxu0 %vm301_vm1, %v1908_v9  ;;  %v254_v8 = vld [vmem:[%s6347_s17 + $0xe0] sm:$0xff]  ;;  %v6712_v9 = vld [vmem:[%s6347_s17 + $0xf4] sm:$0xff] }
  0x5b   : > { %5279 = vmatprep.mubr.msk.f32.mxu1 %vm301_vm1, %v297_v11  ;;  %5503 = vmatprep.mubr.msk.f32.mxu0 %vm301_vm1, %v1909_v12  ;;  %v255_v11 = vld [vmem:[%s6347_s17 + $0xe8] sm:$0xff]  ;;  %v6722_v12 = vld [vmem:[%s6347_s17 + $0xfc] sm:$0xff] }
  0x5e   : > { %5280 = vmatmul.mubr.msk.f32.gmra.mrb[34].mxu1 %vm301_vm1, %v298_v13  ;;  %5504 = vmatmul.mubr.msk.f32.gmra.mrb[34].mxu0 %vm301_vm1, %v1910_v14  ;;  %v256_v13 = vld [vmem:[%s6347_s17 + $0xf0] sm:$0xff]  ;;  %v6726_v14 = vld [vmem:[%s6347_s17 + $0x104] sm:$0xff] }
  0x5f   : > { %5284 = vmatprep.mubr.msk.f32.mxu1 %vm301_vm1, %v226_v15  ;;  %5508 = vmatprep.mubr.msk.f32.mxu0 %vm301_vm1, %v2305_v16  ;;  %v257_v15 = vld [vmem:[%s6347_s17 + $0xf8] sm:$0xff]  ;;  %v6736_v16 = vld [vmem:[%s6347_s17 + $0x10c] sm:$0xff] }
  0x62   : > { %5285 = vmatmul.mubr.msk.f32.vlgmr.msra.gmra.mrb[0].mxu1 %vm301_vm1, %v227_v17  ;;  %5509 = vmatmul.mubr.msk.f32.vlgmr.msra.gmra.mrb[0].mxu0 %vm301_vm1, %v2306_v18  ;;  %v258_v17 = vld [vmem:[%s6347_s17 + $0x100] sm:$0xff]  ;;  %v6740_v18 = vld [vmem:[%s6347_s17 + $0x114] sm:$0xff] }
  0x63   : > { %5563 = vmatpush3.msk.msra.mxu0 %vm410_vm0, %v6362_v10  ;;  %5287 = vmatprep.mubr.msk.f32.mxu1 %vm301_vm1, %v228_v19  ;;  %v231_v10 = vld [vmem:[%s6347_s17 + $0x28] sm:$0xff] }
  0x64   : > { %5511 = vmatprep.mubr.msk.f32.mxu0 %vm301_vm1, %v6514_v20  ;;  %5339 = vmatpush3.msk.msra.mxu1 %vm410_vm0, %v4569_v59  ;;  %v6666_v59 = vld [vmem:[%s6347_s17 + $0xbc] sm:$0xff]  ;;  %v259_v19 = vld [vmem:[%s6347_s17 + $0x108] sm:$0xff] }
  0x65   : > { %5618 = vmatprep.subr.msk.mxu0 %vm410_vm0, %v6521_v21  ;;  %5394 = vmatprep.subr.msk.mxu1 %vm410_vm0, %v6573_v33 }
  0x66   : > { %5288 = vmatmul.mubr.msk.f32.gmra.mrb[2].mxu1 %vm301_vm1, %v229_v22  ;;  %5512 = vmatmul.mubr.msk.f32.gmra.mrb[2].mxu0 %vm301_vm1, %v6528_v23  ;;  %v6750_v22 = vld [vmem:[%s6347_s17 + $0x11c] sm:$0xff] }
  0x67   : > { %5290 = vmatprep.mubr.msk.f32.mxu1 %vm301_vm1, %v230_v24  ;;  %5514 = vmatprep.mubr.msk.f32.mxu0 %vm301_vm1, %v6534_v25  ;;  %v260_v24 = vld [vmem:[%s6347_s17 + $0x110] sm:$0xff] }
  0x6a   : > { %5291 = vmatmul.mubr.msk.f32.gmra.mrb[4].mxu1 %vm301_vm1, %v231_v10  ;;  %5515 = vmatmul.mubr.msk.f32.gmra.mrb[4].mxu0 %vm301_vm1, %v6547_v26  ;;  %v6754_v10 = vld [vmem:[%s6347_s17 + $0x124] sm:$0xff] }
  0x6b   : > { %5293 = vmatprep.mubr.msk.f32.mxu1 %vm301_vm1, %v232_v27  ;;  %5517 = vmatprep.mubr.msk.f32.mxu0 %vm301_vm1, %v6551_v28  ;;  %v261_v27 = vld [vmem:[%s6347_s17 + $0x118] sm:$0xff] }
  0x6e   : > { %5294 = vmatmul.mubr.msk.f32.gmra.mrb[6].mxu1 %vm301_vm1, %v233_v29  ;;  %5518 = vmatmul.mubr.msk.f32.gmra.mrb[6].mxu0 %vm301_vm1, %v6561_v30  ;;  %v6764_v29 = vld [vmem:[%s6347_s17 + $0x12c] sm:$0xff] }
  0x6f   : > { %5296 = vmatprep.mubr.msk.f32.mxu1 %vm301_vm1, %v234_v31  ;;  %5520 = vmatprep.mubr.msk.f32.mxu0 %vm301_vm1, %v6565_v32  ;;  %v1015_v31 = vld [vmem:[%s6347_s17 + $0x2] sm:$0xff] }
  0x72   : > { %5297 = vmatmul.mubr.msk.f32.gmra.mrb[8].mxu1 %vm301_vm1, %v235_v34  ;;  %5521 = vmatmul.mubr.msk.f32.gmra.mrb[8].mxu0 %vm301_vm1, %v6580_v35  ;;  %v1016_v34 = vld [vmem:[%s6347_s17 + $0xa] sm:$0xff] }
  0x73   : > { %5299 = vmatprep.mubr.msk.f32.mxu1 %vm301_vm1, %v236_v36  ;;  %5523 = vmatprep.mubr.msk.f32.mxu0 %vm301_vm1, %v6584_v37  ;;  %v6775_v36 = vld [vmem:[%s6347_s17 + $0x12] sm:$0xff] }
  0x76   : > { %5300 = vmatmul.mubr.msk.f32.gmra.mrb[10].mxu1 %vm301_vm1, %v237_v38  ;;  %5524 = vmatmul.mubr.msk.f32.gmra.mrb[10].mxu0 %vm301_vm1, %v6596_v39  ;;  %v6783_v38 = vld [vmem:[%s7557_s1 + $0x20] sm:$0xf] }
  0x77   : > { %5302 = vmatprep.mubr.msk.f32.mxu1 %vm301_vm1, %v238_v40  ;;  %5526 = vmatprep.mubr.msk.f32.mxu0 %vm301_vm1, %v6600_v41  ;;  %v6795_v40 = vld [vmem:[%s6347_s17 + $0x22] sm:$0xff] }
  0x7a   : > { %5303 = vmatmul.mubr.msk.f32.gmra.mrb[12].mxu1 %vm301_vm1, %v239_v42  ;;  %5527 = vmatmul.mubr.msk.f32.gmra.mrb[12].mxu0 %vm301_vm1, %v6610_v43  ;;  %v6894_v42 = vld [vmem:[%s6347_s17 + $0x8a] sm:$0xff] }
  0x7b   : > { %5305 = vmatprep.mubr.msk.f32.mxu1 %vm301_vm1, %v240_v44  ;;  %5529 = vmatprep.mubr.msk.f32.mxu0 %vm301_vm1, %v6614_v45  ;;  %v6908_v44 = vld [vmem:[%s6347_s17 + $0x9a] sm:$0xff] }
  0x7e   : > { %5306 = vmatmul.mubr.msk.f32.gmra.mrb[14].mxu1 %vm301_vm1, %v241_v46  ;;  %5530 = vmatmul.mubr.msk.f32.gmra.mrb[14].mxu0 %vm301_vm1, %v6624_v47  ;;  %v6922_v46 = vld [vmem:[%s6347_s17 + $0xaa] sm:$0xff] }
  0x7f   : > { %5308 = vmatprep.mubr.msk.f32.mxu1 %vm301_vm1, %v242_v48  ;;  %5532 = vmatprep.mubr.msk.f32.mxu0 %vm301_vm1, %v6628_v49  ;;  %v6936_v48 = vld [vmem:[%s6347_s17 + $0xba] sm:$0xff] }
  0x82   : > { %5309 = vmatmul.mubr.msk.f32.gmra.mrb[16].mxu1 %vm301_vm1, %v243_v50  ;;  %5533 = vmatmul.mubr.msk.f32.gmra.mrb[16].mxu0 %vm301_vm1, %v6638_v51  ;;  %v6950_v50 = vld [vmem:[%s6347_s17 + $0xca] sm:$0xff] }
  0x83   : > { %5311 = vmatprep.mubr.msk.f32.mxu1 %vm301_vm1, %v244_v52  ;;  %5535 = vmatprep.mubr.msk.f32.mxu0 %vm301_vm1, %v6642_v53  ;;  %v6964_v52 = vld [vmem:[%s6347_s17 + $0xda] sm:$0xff] }
  0x86   : > { %5312 = vmatmul.mubr.msk.f32.gmra.mrb[18].mxu1 %vm301_vm1, %v245_v54  ;;  %5536 = vmatmul.mubr.msk.f32.gmra.mrb[18].mxu0 %vm301_vm1, %v6652_v55  ;;  %v6978_v54 = vld [vmem:[%s6347_s17 + $0xea] sm:$0xff] }
  0x87   : > { %5314 = vmatprep.mubr.msk.f32.mxu1 %vm301_vm1, %v246_v56  ;;  %5538 = vmatprep.mubr.msk.f32.mxu0 %vm301_vm1, %v6656_v57  ;;  %v6992_v56 = vld [vmem:[%s6347_s17 + $0xfa] sm:$0xff] }
  0x8a   : > { %5315 = vmatmul.mubr.msk.f32.gmra.mrb[20].mxu1 %vm301_vm1, %v247_v58  ;;  %5539 = vmatmul.mubr.msk.f32.gmra.mrb[20].mxu0 %vm301_vm1, %v6666_v59  ;;  %v7006_v58 = vld [vmem:[%s6347_s17 + $0x10a] sm:$0xff] }
  0x8b   : > { %5317 = vmatprep.mubr.msk.f32.mxu1 %vm301_vm1, %v248_v60  ;;  %5541 = vmatprep.mubr.msk.f32.mxu0 %vm301_vm1, %v6670_v61  ;;  %v2769_v60 = vld [vmem:[%s6347_s17 + $0x134] sm:$0xff] }
  0x8e   : > { %5318 = vmatmul.mubr.msk.f32.gmra.mrb[22].mxu1 %vm301_vm1, %v249_v62  ;;  %5542 = vmatmul.mubr.msk.f32.gmra.mrb[22].mxu0 %vm301_vm1, %v6680_v63  ;;  %v2770_v62 = vld [vmem:[%s6347_s17 + $0x13c] sm:$0xff] }
  0x8f   : > { %5320 = vmatprep.mubr.msk.f32.mxu1 %vm301_vm1, %v250_v0  ;;  %5544 = vmatprep.mubr.msk.f32.mxu0 %vm301_vm1, %v6684_v1  ;;  %v3166_v0 = vld [vmem:[%s6347_s17 + $0x2d] sm:$0xff] }
  0x92   : > { %5321 = vmatmul.mubr.msk.f32.gmra.mrb[24].mxu1 %vm301_vm1, %v251_v2  ;;  %5545 = vmatmul.mubr.msk.f32.gmra.mrb[24].mxu0 %vm301_vm1, %v6694_v3  ;;  %v3168_v2 = vld [vmem:[%s6347_s17 + $0x3d] sm:$0xff] }
  0x93   : > { %5323 = vmatprep.mubr.msk.f32.mxu1 %vm301_vm1, %v252_v4  ;;  %5547 = vmatprep.mubr.msk.f32.mxu0 %vm301_vm1, %v6698_v5  ;;  %v3170_v4 = vld [vmem:[%s6347_s17 + $0x4d] sm:$0xff] }
  0x96   : > { %5324 = vmatmul.mubr.msk.f32.gmra.mrb[26].mxu1 %vm301_vm1, %v253_v6  ;;  %5548 = vmatmul.mubr.msk.f32.gmra.mrb[26].mxu0 %vm301_vm1, %v6708_v7  ;;  %v3172_v6 = vld [vmem:[%s6347_s17 + $0x5d] sm:$0xff] }
  0x97   : > { %5326 = vmatprep.mubr.msk.f32.mxu1 %vm301_vm1, %v254_v8  ;;  %5550 = vmatprep.mubr.msk.f32.mxu0 %vm301_vm1, %v6712_v9  ;;  %v3174_v8 = vld [vmem:[%s6347_s17 + $0x6d] sm:$0xff] }
  0x9a   : > { %5327 = vmatmul.mubr.msk.f32.gmra.mrb[28].mxu1 %vm301_vm1, %v255_v11  ;;  %5551 = vmatmul.mubr.msk.f32.gmra.mrb[28].mxu0 %vm301_vm1, %v6722_v12  ;;  %v3176_v11 = vld [vmem:[%s6347_s17 + $0x7d] sm:$0xff] }
  0x9b   : > { %5329 = vmatprep.mubr.msk.f32.mxu1 %vm301_vm1, %v256_v13  ;;  %5553 = vmatprep.mubr.msk.f32.mxu0 %vm301_vm1, %v6726_v14  ;;  %v3178_v13 = vld [vmem:[%s6347_s17 + $0x8d] sm:$0xff] }
  0x9e   : > { %5330 = vmatmul.mubr.msk.f32.gmra.mrb[30].mxu1 %vm301_vm1, %v257_v15  ;;  %5554 = vmatmul.mubr.msk.f32.gmra.mrb[30].mxu0 %vm301_vm1, %v6736_v16  ;;  %v3180_v15 = vld [vmem:[%s6347_s17 + $0x9d] sm:$0xff] }
  0x9f   : > { %5332 = vmatprep.mubr.msk.f32.mxu1 %vm301_vm1, %v258_v17  ;;  %5556 = vmatprep.mubr.msk.f32.mxu0 %vm301_vm1, %v6740_v18  ;;  %v3182_v17 = vld [vmem:[%s6347_s17 + $0xad] sm:$0xff] }
  0xa2   : > { %5333 = vmatmul.mubr.msk.f32.gmra.mrb[32].mxu1 %vm301_vm1, %v259_v19  ;;  %5557 = vmatmul.mubr.msk.f32.gmra.mrb[32].mxu0 %vm301_vm1, %v6750_v22  ;;  %v3184_v19 = vld [vmem:[%s6347_s17 + $0xbd] sm:$0xff] }
  0xa3   : > { %5335 = vmatprep.mubr.msk.f32.mxu1 %vm301_vm1, %v260_v24  ;;  %5559 = vmatprep.mubr.msk.f32.mxu0 %vm301_vm1, %v6754_v10  ;;  %v3186_v24 = vld [vmem:[%s6347_s17 + $0xcd] sm:$0xff] }
  0xa6   : > { %5336 = vmatmul.mubr.msk.f32.gmra.mrb[34].mxu1 %vm301_vm1, %v261_v27  ;;  %5560 = vmatmul.mubr.msk.f32.gmra.mrb[34].mxu0 %vm301_vm1, %v6764_v29  ;;  %v3188_v27 = vld [vmem:[%s6347_s17 + $0xdd] sm:$0xff] }
  0xa7   : > { %5340 = vmatprep.mubr.msk.f32.mxu1 %vm301_vm1, %v1015_v31  ;;  %5564 = vmatprep.mubr.msk.f32.mxu0 %vm301_vm1, %v6514_v20  ;;  %v6790_v20 = vld [vmem:[%s6347_s17 + $0x1a] sm:$0xff]  ;;  %v3190_v31 = vld [vmem:[%s6347_s17 + $0xed] sm:$0xff] }
  0xaa   : > { %5341 = vmatmul.mubr.msk.f32.vlgmr.msra.gmra.mrb[0].mxu1 %vm301_vm1, %v1016_v34  ;;  %5565 = vmatmul.mubr.msk.f32.vlgmr.msra.gmra.mrb[0].mxu0 %vm301_vm1, %v6528_v23  ;;  %v6813_v23 = vld [vmem:[%s6347_s17 + $0x32] sm:$0xff] }
  0xab   : > { %5619 = vmatpush3.msk.msra.mxu0 %vm410_vm0, %v6521_v21  ;;  %5343 = vmatprep.mubr.msk.f32.mxu1 %vm301_vm1, %v6775_v36  ;;  %v6810_v21 = vld [vmem:[%s6347_s17 + $0x2a] sm:$0xff]  ;;  %v3191_v34 = vld [vmem:[%s6347_s17 + $0xf5] sm:$0xff] }
  0xac   : > { %5567 = vmatprep.mubr.msk.f32.mxu0 %vm301_vm1, %v6534_v25  ;;  %5395 = vmatpush3.msk.msra.mxu1 %vm410_vm0, %v6573_v33  ;;  %v6824_v25 = vld [vmem:[%s6347_s17 + $0x3a] sm:$0xff]  ;;  %v6855_v33 = vld [vmem:[%s6347_s17 + $0x62] sm:$0xff] }
  0xad   : > { %5674 = vmatprep.subr.msk.mxu0 %vm410_vm0, %v6783_v38 }
  0xae   : > { %5344 = vmatmul.mubr.msk.f32.gmra.mrb[2].mxu1 %vm301_vm1, %v6790_v20  ;;  %5568 = vmatmul.mubr.msk.f32.gmra.mrb[2].mxu0 %vm301_vm1, %v6547_v26  ;;  %v6827_v26 = vld [vmem:[%s6347_s17 + $0x42] sm:$0xff] }
  0xaf   : > { %5346 = vmatprep.mubr.msk.f32.mxu1 %vm301_vm1, %v6795_v40  ;;  %5570 = vmatprep.mubr.msk.f32.mxu0 %vm301_vm1, %v6551_v28  ;;  %v6838_v28 = vld [vmem:[%s6347_s17 + $0x4a] sm:$0xff] }
  0xb2   : > { %5347 = vmatmul.mubr.msk.f32.gmra.mrb[4].mxu1 %vm301_vm1, %v6810_v21  ;;  %5571 = vmatmul.mubr.msk.f32.gmra.mrb[4].mxu0 %vm301_vm1, %v6561_v30  ;;  %v6841_v30 = vld [vmem:[%s6347_s17 + $0x52] sm:$0xff] }
  0xb3   : > { %5349 = vmatprep.mubr.msk.f32.mxu1 %vm301_vm1, %v6813_v23  ;;  %5573 = vmatprep.mubr.msk.f32.mxu0 %vm301_vm1, %v6565_v32  ;;  %v6852_v32 = vld [vmem:[%s6347_s17 + $0x5a] sm:$0xff] }
  0xb6   : > { %5350 = vmatmul.mubr.msk.f32.gmra.mrb[6].mxu1 %vm301_vm1, %v6824_v25  ;;  %5574 = vmatmul.mubr.msk.f32.gmra.mrb[6].mxu0 %vm301_vm1, %v6580_v35  ;;  %v6866_v35 = vld [vmem:[%s6347_s17 + $0x6a] sm:$0xff] }
  0xb7   : > { %5352 = vmatprep.mubr.msk.f32.mxu1 %vm301_vm1, %v6827_v26  ;;  %5576 = vmatprep.mubr.msk.f32.mxu0 %vm301_vm1, %v6584_v37  ;;  %v6869_v37 = vld [vmem:[%s6347_s17 + $0x72] sm:$0xff] }
  0xba   : > { %5353 = vmatmul.mubr.msk.f32.gmra.mrb[8].mxu1 %vm301_vm1, %v6838_v28  ;;  %5577 = vmatmul.mubr.msk.f32.gmra.mrb[8].mxu0 %vm301_vm1, %v6596_v39  ;;  %v6880_v39 = vld [vmem:[%s6347_s17 + $0x7a] sm:$0xff] }
  0xbb   : > { %5355 = vmatprep.mubr.msk.f32.mxu1 %vm301_vm1, %v6841_v30  ;;  %5579 = vmatprep.mubr.msk.f32.mxu0 %vm301_vm1, %v6600_v41  ;;  %v6883_v41 = vld [vmem:[%s6347_s17 + $0x82] sm:$0xff] }
  0xbe   : > { %5356 = vmatmul.mubr.msk.f32.gmra.mrb[10].mxu1 %vm301_vm1, %v6852_v32  ;;  %5580 = vmatmul.mubr.msk.f32.gmra.mrb[10].mxu0 %vm301_vm1, %v6610_v43  ;;  %v6897_v43 = vld [vmem:[%s6347_s17 + $0x92] sm:$0xff] }
  0xbf   : > { %5358 = vmatprep.mubr.msk.f32.mxu1 %vm301_vm1, %v6855_v33  ;;  %5582 = vmatprep.mubr.msk.f32.mxu0 %vm301_vm1, %v6614_v45  ;;  %v6911_v45 = vld [vmem:[%s6347_s17 + $0xa2] sm:$0xff] }
  0xc2   : > { %5359 = vmatmul.mubr.msk.f32.gmra.mrb[12].mxu1 %vm301_vm1, %v6866_v35  ;;  %5583 = vmatmul.mubr.msk.f32.gmra.mrb[12].mxu0 %vm301_vm1, %v6624_v47  ;;  %v6925_v47 = vld [vmem:[%s6347_s17 + $0xb2] sm:$0xff] }
  0xc3   : > { %5361 = vmatprep.mubr.msk.f32.mxu1 %vm301_vm1, %v6869_v37  ;;  %5585 = vmatprep.mubr.msk.f32.mxu0 %vm301_vm1, %v6628_v49  ;;  %v6939_v49 = vld [vmem:[%s6347_s17 + $0xc2] sm:$0xff] }
  0xc6   : > { %5362 = vmatmul.mubr.msk.f32.gmra.mrb[14].mxu1 %vm301_vm1, %v6880_v39  ;;  %5586 = vmatmul.mubr.msk.f32.gmra.mrb[14].mxu0 %vm301_vm1, %v6638_v51  ;;  %v6953_v51 = vld [vmem:[%s6347_s17 + $0xd2] sm:$0xff] }
  0xc7   : > { %5364 = vmatprep.mubr.msk.f32.mxu1 %vm301_vm1, %v6883_v41  ;;  %5588 = vmatprep.mubr.msk.f32.mxu0 %vm301_vm1, %v6642_v53  ;;  %v6967_v53 = vld [vmem:[%s6347_s17 + $0xe2] sm:$0xff] }
  0xca   : > { %5365 = vmatmul.mubr.msk.f32.gmra.mrb[16].mxu1 %vm301_vm1, %v6894_v42  ;;  %5589 = vmatmul.mubr.msk.f32.gmra.mrb[16].mxu0 %vm301_vm1, %v6652_v55  ;;  %v6981_v55 = vld [vmem:[%s6347_s17 + $0xf2] sm:$0xff] }
  0xcb   : > { %5367 = vmatprep.mubr.msk.f32.mxu1 %vm301_vm1, %v6897_v43  ;;  %5591 = vmatprep.mubr.msk.f32.mxu0 %vm301_vm1, %v6656_v57  ;;  %v6995_v57 = vld [vmem:[%s6347_s17 + $0x102] sm:$0xff] }
  0xce   : > { %5368 = vmatmul.mubr.msk.f32.gmra.mrb[18].mxu1 %vm301_vm1, %v6908_v44  ;;  %5592 = vmatmul.mubr.msk.f32.gmra.mrb[18].mxu0 %vm301_vm1, %v6666_v59  ;;  %v7009_v59 = vld [vmem:[%s6347_s17 + $0x112] sm:$0xff] }
  0xcf   : > { %5370 = vmatprep.mubr.msk.f32.mxu1 %vm301_vm1, %v6911_v45  ;;  %5594 = vmatprep.mubr.msk.f32.mxu0 %vm301_vm1, %v6670_v61  ;;  %v7020_v61 = vld [vmem:[%s6347_s17 + $0x11a] sm:$0xff] }
  0xd2   : > { %5371 = vmatmul.mubr.msk.f32.gmra.mrb[20].mxu1 %vm301_vm1, %v6922_v46  ;;  %5595 = vmatmul.mubr.msk.f32.gmra.mrb[20].mxu0 %vm301_vm1, %v6680_v63  ;;  %v3165_v63 = vld [vmem:[%s6347_s17 + $0x25] sm:$0xff] }
  0xd3   : > { %5373 = vmatprep.mubr.msk.f32.mxu1 %vm301_vm1, %v6925_v47  ;;  %5597 = vmatprep.mubr.msk.f32.mxu0 %vm301_vm1, %v6684_v1  ;;  %v3167_v1 = vld [vmem:[%s6347_s17 + $0x35] sm:$0xff] }
  0xd6   : > { %5374 = vmatmul.mubr.msk.f32.gmra.mrb[22].mxu1 %vm301_vm1, %v6936_v48  ;;  %5598 = vmatmul.mubr.msk.f32.gmra.mrb[22].mxu0 %vm301_vm1, %v6694_v3  ;;  %v3169_v3 = vld [vmem:[%s6347_s17 + $0x45] sm:$0xff] }
  0xd7   : > { %5376 = vmatprep.mubr.msk.f32.mxu1 %vm301_vm1, %v6939_v49  ;;  %5600 = vmatprep.mubr.msk.f32.mxu0 %vm301_vm1, %v6698_v5  ;;  %v3171_v5 = vld [vmem:[%s6347_s17 + $0x55] sm:$0xff] }
  0xda   : > { %5377 = vmatmul.mubr.msk.f32.gmra.mrb[24].mxu1 %vm301_vm1, %v6950_v50  ;;  %5601 = vmatmul.mubr.msk.f32.gmra.mrb[24].mxu0 %vm301_vm1, %v6708_v7  ;;  %v3173_v7 = vld [vmem:[%s6347_s17 + $0x65] sm:$0xff] }
  0xdb   : > { %5379 = vmatprep.mubr.msk.f32.mxu1 %vm301_vm1, %v6953_v51  ;;  %5603 = vmatprep.mubr.msk.f32.mxu0 %vm301_vm1, %v6712_v9  ;;  %v3175_v9 = vld [vmem:[%s6347_s17 + $0x75] sm:$0xff] }
  0xde   : > { %5380 = vmatmul.mubr.msk.f32.gmra.mrb[26].mxu1 %vm301_vm1, %v6964_v52  ;;  %5604 = vmatmul.mubr.msk.f32.gmra.mrb[26].mxu0 %vm301_vm1, %v6722_v12  ;;  %v3177_v12 = vld [vmem:[%s6347_s17 + $0x85] sm:$0xff] }
  0xdf   : > { %5382 = vmatprep.mubr.msk.f32.mxu1 %vm301_vm1, %v6967_v53  ;;  %5606 = vmatprep.mubr.msk.f32.mxu0 %vm301_vm1, %v6726_v14  ;;  %v3179_v14 = vld [vmem:[%s6347_s17 + $0x95] sm:$0xff] }
  0xe2   : > { %5383 = vmatmul.mubr.msk.f32.gmra.mrb[28].mxu1 %vm301_vm1, %v6978_v54  ;;  %5607 = vmatmul.mubr.msk.f32.gmra.mrb[28].mxu0 %vm301_vm1, %v6736_v16  ;;  %v3181_v16 = vld [vmem:[%s6347_s17 + $0xa5] sm:$0xff] }
  0xe3   : > { %5385 = vmatprep.mubr.msk.f32.mxu1 %vm301_vm1, %v6981_v55  ;;  %5609 = vmatprep.mubr.msk.f32.mxu0 %vm301_vm1, %v6740_v18  ;;  %v3183_v18 = vld [vmem:[%s6347_s17 + $0xb5] sm:$0xff] }
  0xe6   : > { %5386 = vmatmul.mubr.msk.f32.gmra.mrb[30].mxu1 %vm301_vm1, %v6992_v56  ;;  %5610 = vmatmul.mubr.msk.f32.gmra.mrb[30].mxu0 %vm301_vm1, %v6750_v22  ;;  %v3185_v22 = vld [vmem:[%s6347_s17 + $0xc5] sm:$0xff] }
  0xe7   : > { %5388 = vmatprep.mubr.msk.f32.mxu1 %vm301_vm1, %v6995_v57  ;;  %5612 = vmatprep.mubr.msk.f32.mxu0 %vm301_vm1, %v6754_v10  ;;  %v3187_v10 = vld [vmem:[%s6347_s17 + $0xd5] sm:$0xff] }
  0xea   : > { %5389 = vmatmul.mubr.msk.f32.gmra.mrb[32].mxu1 %vm301_vm1, %v7006_v58  ;;  %5613 = vmatmul.mubr.msk.f32.gmra.mrb[32].mxu0 %vm301_vm1, %v6764_v29  ;;  %v3189_v29 = vld [vmem:[%s6347_s17 + $0xe5] sm:$0xff] }
  0xeb   : > { %5391 = vmatprep.mubr.msk.f32.mxu1 %vm301_vm1, %v7009_v59  ;;  %5615 = vmatprep.mubr.msk.f32.mxu0 %vm301_vm1, %v2769_v60 }
  0xee   : > { %5392 = vmatmul.mubr.msk.f32.gmra.mrb[34].mxu1 %vm301_vm1, %v7020_v61  ;;  %5616 = vmatmul.mubr.msk.f32.gmra.mrb[34].mxu0 %vm301_vm1, %v2770_v62  ;;  %v3614_v62 = vld [vmem:[%s6347_s17 + $0xbe] sm:$0xff] }
  0xef   : > { %5396 = vmatprep.mubr.msk.f32.mxu1 %vm301_vm1, %v6775_v36  ;;  %5620 = vmatprep.mubr.msk.f32.mxu0 %vm301_vm1, %v3165_v63  ;;  %v3192_v36 = vld [vmem:[%s6347_s17 + $0xfd] sm:$0xff]  ;;  %v3615_v63 = vld [vmem:[%s6347_s17 + $0xc6] sm:$0xff] }
  0xf2   : > { %5397 = vmatmul.mubr.msk.f32.vlgmr.msra.gmra.mrb[0].mxu1 %vm301_vm1, %v6790_v20  ;;  %5621 = vmatmul.mubr.msk.f32.vlgmr.msra.gmra.mrb[0].mxu0 %vm301_vm1, %v3166_v0  ;;  %v3194_v20 = vld [vmem:[%s6347_s17 + $0x10d] sm:$0xff]  ;;  %v4108_v0 = vld [vmem:[%s7559_s3 + $0x20] sm:$0xff] }
  0xf3   : > { %5675 = vmatpush3.msk.msra.mxu0 %vm410_vm0, %v6783_v38  ;;  %5399 = vmatprep.mubr.msk.f32.mxu1 %vm301_vm1, %v6795_v40  ;;  %v3193_v38 = vld [vmem:[%s6347_s17 + $0x105] sm:$0xff]  ;;  %v3195_v40 = vld [vmem:[%s6347_s17 + $0x115] sm:$0xff] }
  0xf4   : > { %5623 = vmatprep.mubr.msk.f32.mxu0 %vm301_vm1, %v3167_v1  ;;  %v4109_v1 = vld [vmem:[%s7559_s3 + $0x28] sm:$0xff] }
  0xf6   : > { %5400 = vmatmul.mubr.msk.f32.gmra.mrb[2].mxu1 %vm301_vm1, %v6810_v21  ;;  %5624 = vmatmul.mubr.msk.f32.gmra.mrb[2].mxu0 %vm301_vm1, %v3168_v2  ;;  %v3196_v21 = vld [vmem:[%s6347_s17 + $0x11d] sm:$0xff]  ;;  %v3616_v2 = vld [vmem:[%s6347_s17 + $0xce] sm:$0xff] }
  0xf7   : > { %5402 = vmatprep.mubr.msk.f32.mxu1 %vm301_vm1, %v6813_v23  ;;  %5626 = vmatprep.mubr.msk.f32.mxu0 %vm301_vm1, %v3169_v3  ;;  %v3197_v23 = vld [vmem:[%s6347_s17 + $0x125] sm:$0xff]  ;;  %v5824_v3 = vpack.c.bf16 %v4109_v1, %v4108_v0 }
  0xfa   : > { %5403 = vmatmul.mubr.msk.f32.gmra.mrb[4].mxu1 %vm301_vm1, %v6824_v25  ;;  %5627 = vmatmul.mubr.msk.f32.gmra.mrb[4].mxu0 %vm301_vm1, %v3170_v4  ;;  %v3198_v25 = vld [vmem:[%s6347_s17 + $0x12d] sm:$0xff]  ;;  %v3617_v4 = vld [vmem:[%s6347_s17 + $0xd6] sm:$0xff] }
  0xfb   : > { %5405 = vmatprep.mubr.msk.f32.mxu1 %vm301_vm1, %v6827_v26  ;;  %5629 = vmatprep.mubr.msk.f32.mxu0 %vm301_vm1, %v3171_v5  ;;  %v1479_v26 = vld [vmem:[%s6347_s17 + $0x122] sm:$0xff] }
  0xfc   : > { %v3618_v5 = vld [vmem:[%s6347_s17 + $0xde] sm:$0xff] }
  0xfe   : > { %5406 = vmatmul.mubr.msk.f32.gmra.mrb[6].mxu1 %vm301_vm1, %v6838_v28  ;;  %5630 = vmatmul.mubr.msk.f32.gmra.mrb[6].mxu0 %vm301_vm1, %v3172_v6  ;;  %v3199_v28 = vld [vmem:[%s6347_s17 + $0x135] sm:$0xff]  ;;  %v3619_v6 = vld [vmem:[%s6347_s17 + $0xe6] sm:$0xff] }
  0xff   : > { %5408 = vmatprep.mubr.msk.f32.mxu1 %vm301_vm1, %v6841_v30  ;;  %5632 = vmatprep.mubr.msk.f32.mxu0 %vm301_vm1, %v3173_v7  ;;  %v1480_v30 = vld [vmem:[%s6347_s17 + $0x12a] sm:$0xff] }
 0x100   : > { %v4110_v7 = vld [vmem:[%s7559_s3 + $0x30] sm:$0xff] }
 0x102   : > { %5409 = vmatmul.mubr.msk.f32.gmra.mrb[8].mxu1 %vm301_vm1, %v6852_v32  ;;  %5633 = vmatmul.mubr.msk.f32.gmra.mrb[8].mxu0 %vm301_vm1, %v3174_v8  ;;  %v3200_v32 = vld [vmem:[%s6347_s17 + $0x13d] sm:$0xff] }
 0x103   : > { %5411 = vmatprep.mubr.msk.f32.mxu1 %vm301_vm1, %v6855_v33  ;;  %5635 = vmatprep.mubr.msk.f32.mxu0 %vm301_vm1, %v3175_v9  ;;  %v3595_v33 = vld [vmem:[%s6347_s17 + $0x26] sm:$0xff]  ;;  %v4111_v8 = vld [vmem:[%s7559_s3 + $0x38] sm:$0xff]  ;;  %v3620_v9 = vld [vmem:[%s6347_s17 + $0xee] sm:$0xff] }
 0x106   : > { %5412 = vmatmul.mubr.msk.f32.gmra.mrb[10].mxu1 %vm301_vm1, %v6866_v35  ;;  %5636 = vmatmul.mubr.msk.f32.gmra.mrb[10].mxu0 %vm301_vm1, %v3176_v11  ;;  %v3596_v35 = vld [vmem:[%s6347_s17 + $0x2e] sm:$0xff]  ;;  %v5828_v11 = vpack.c.bf16 %v4111_v8, %v4110_v7 }
 0x107   : > { %5414 = vmatprep.mubr.msk.f32.mxu1 %vm301_vm1, %v6869_v37  ;;  %5638 = vmatprep.mubr.msk.f32.mxu0 %vm301_vm1, %v3177_v12  ;;  %v3597_v37 = vld [vmem:[%s6347_s17 + $0x36] sm:$0xff] }
 0x108   : > { %v3621_v12 = vld [vmem:[%s6347_s17 + $0xf6] sm:$0xff] }
 0x10a   : > { %5415 = vmatmul.mubr.msk.f32.gmra.mrb[12].mxu1 %vm301_vm1, %v6880_v39  ;;  %5639 = vmatmul.mubr.msk.f32.gmra.mrb[12].mxu0 %vm301_vm1, %v3178_v13  ;;  %v3598_v39 = vld [vmem:[%s6347_s17 + $0x3e] sm:$0xff] }
 0x10b   : > { %5417 = vmatprep.mubr.msk.f32.mxu1 %vm301_vm1, %v6883_v41  ;;  %5641 = vmatprep.mubr.msk.f32.mxu0 %vm301_vm1, %v3179_v14  ;;  %v3599_v41 = vld [vmem:[%s6347_s17 + $0x46] sm:$0xff]  ;;  %v3622_v13 = vld [vmem:[%s6347_s17 + $0xfe] sm:$0xff] }
 0x10c   : > { %v3623_v14 = vld [vmem:[%s6347_s17 + $0x106] sm:$0xff] }
 0x10e   : > { %5418 = vmatmul.mubr.msk.f32.gmra.mrb[14].mxu1 %vm301_vm1, %v6894_v42  ;;  %5642 = vmatmul.mubr.msk.f32.gmra.mrb[14].mxu0 %vm301_vm1, %v3180_v15  ;;  %v3600_v42 = vld [vmem:[%s6347_s17 + $0x4e] sm:$0xff] }
 0x10f   : > { %5420 = vmatprep.mubr.msk.f32.mxu1 %vm301_vm1, %v6897_v43  ;;  %5644 = vmatprep.mubr.msk.f32.mxu0 %vm301_vm1, %v3181_v16  ;;  %v3601_v43 = vld [vmem:[%s6347_s17 + $0x56] sm:$0xff]  ;;  %v3624_v15 = vld [vmem:[%s6347_s17 + $0x10e] sm:$0xff] }
 0x110   : > { %v3625_v16 = vld [vmem:[%s6347_s17 + $0x116] sm:$0xff] }
 0x112   : > { %5421 = vmatmul.mubr.msk.f32.gmra.mrb[16].mxu1 %vm301_vm1, %v6908_v44  ;;  %5645 = vmatmul.mubr.msk.f32.gmra.mrb[16].mxu0 %vm301_vm1, %v3182_v17  ;;  %v3602_v44 = vld [vmem:[%s6347_s17 + $0x5e] sm:$0xff] }
 0x113   : > { %5423 = vmatprep.mubr.msk.f32.mxu1 %vm301_vm1, %v6911_v45  ;;  %5647 = vmatprep.mubr.msk.f32.mxu0 %vm301_vm1, %v3183_v18  ;;  %v3603_v45 = vld [vmem:[%s6347_s17 + $0x66] sm:$0xff] }
 0x114   : > { %v4112_v17 = vld [vmem:[%s7559_s3 + $0x40] sm:$0xff]  ;;  %v4113_v18 = vld [vmem:[%s7559_s3 + $0x48] sm:$0xff] }
 0x116   : > { %5424 = vmatmul.mubr.msk.f32.gmra.mrb[18].mxu1 %vm301_vm1, %v6922_v46  ;;  %5648 = vmatmul.mubr.msk.f32.gmra.mrb[18].mxu0 %vm301_vm1, %v3184_v19  ;;  %v3604_v46 = vld [vmem:[%s6347_s17 + $0x6e] sm:$0xff]  ;;  %v5832_v19 = vpack.c.bf16 %v4113_v18, %v4112_v17 }
 0x117   : > { %5426 = vmatprep.mubr.msk.f32.mxu1 %vm301_vm1, %v6925_v47  ;;  %5650 = vmatprep.mubr.msk.f32.mxu0 %vm301_vm1, %v3185_v22  ;;  %v3605_v47 = vld [vmem:[%s6347_s17 + $0x76] sm:$0xff]  ;;  %v3626_v22 = vld [vmem:[%s6347_s17 + $0x11e] sm:$0xff] }
 0x11a   : > { %5427 = vmatmul.mubr.msk.f32.gmra.mrb[20].mxu1 %vm301_vm1, %v6936_v48  ;;  %5651 = vmatmul.mubr.msk.f32.gmra.mrb[20].mxu0 %vm301_vm1, %v3186_v24  ;;  %v3606_v48 = vld [vmem:[%s6347_s17 + $0x7e] sm:$0xff]  ;;  %v3627_v24 = vld [vmem:[%s6347_s17 + $0x126] sm:$0xff] }
 0x11b   : > { %5429 = vmatprep.mubr.msk.f32.mxu1 %vm301_vm1, %v6939_v49  ;;  %5653 = vmatprep.mubr.msk.f32.mxu0 %vm301_vm1, %v3187_v10  ;;  %v3607_v49 = vld [vmem:[%s6347_s17 + $0x86] sm:$0xff]  ;;  %v3628_v10 = vld [vmem:[%s6347_s17 + $0x12e] sm:$0xff] }
 0x11e   : > { %5430 = vmatmul.mubr.msk.f32.gmra.mrb[22].mxu1 %vm301_vm1, %v6950_v50  ;;  %5654 = vmatmul.mubr.msk.f32.gmra.mrb[22].mxu0 %vm301_vm1, %v3188_v27  ;;  %v4104_v50 = vld [vmem:[%s7559_s3] sm:$0xff]  ;;  %v3629_v27 = vld [vmem:[%s6347_s17 + $0x136] sm:$0xff] }
 0x11f   : > { %5432 = vmatprep.mubr.msk.f32.mxu1 %vm301_vm1, %v6953_v51  ;;  %5656 = vmatprep.mubr.msk.f32.mxu0 %vm301_vm1, %v3189_v29  ;;  %v4105_v51 = vld [vmem:[%s7559_s3 + $0x8] sm:$0xff]  ;;  %v4114_v29 = vld [vmem:[%s7559_s3 + $0x50] sm:$0xff] }
 0x122   : > { %5433 = vmatmul.mubr.msk.f32.gmra.mrb[24].mxu1 %vm301_vm1, %v6964_v52  ;;  %5657 = vmatmul.mubr.msk.f32.gmra.mrb[24].mxu0 %vm301_vm1, %v3190_v31  ;;  %v5816_v52 = vpack.c.bf16 %v4105_v51, %v4104_v50  ;;  %v4115_v31 = vld [vmem:[%s7559_s3 + $0x58] sm:$0xff] }
 0x123   : > { %5435 = vmatprep.mubr.msk.f32.mxu1 %vm301_vm1, %v6967_v53  ;;  %5659 = vmatprep.mubr.msk.f32.mxu0 %vm301_vm1, %v3191_v34  ;;  %v3608_v53 = vld [vmem:[%s6347_s17 + $0x8e] sm:$0xff]  ;;  %v3630_v34 = vld [vmem:[%s6347_s17 + $0x13e] sm:$0xff] }
 0x124   : > { %5817 = vmatprep.subr.bf16.mxu1 %v5816_v52 }
 0x125   : > { %5819 = vmatpush3.bf16.msra.mxu1 %v5816_v52 }
 0x126   : > { %5436 = vmatmul.mubr.msk.f32.gmra.mrb[26].mxu1 %vm301_vm1, %v6978_v54  ;;  %5660 = vmatmul.mubr.msk.f32.gmra.mrb[26].mxu0 %vm301_vm1, %v3192_v36  ;;  %v3609_v54 = vld [vmem:[%s6347_s17 + $0x96] sm:$0xff]  ;;  %v5836_v36 = vpack.c.bf16 %v4115_v31, %v4114_v29 }
 0x127   : > { %5438 = vmatprep.mubr.msk.f32.mxu1 %vm301_vm1, %v6981_v55  ;;  %5662 = vmatprep.mubr.msk.f32.mxu0 %vm301_vm1, %v3193_v38  ;;  %v3610_v55 = vld [vmem:[%s6347_s17 + $0x9e] sm:$0xff] }
 0x128   : > { %v4116_v38 = vld [vmem:[%s7559_s3 + $0x60] sm:$0xff] }
 0x12a   : > { %5439 = vmatmul.mubr.msk.f32.gmra.mrb[28].mxu1 %vm301_vm1, %v6992_v56  ;;  %5663 = vmatmul.mubr.msk.f32.gmra.mrb[28].mxu0 %vm301_vm1, %v3194_v20  ;;  %v3611_v56 = vld [vmem:[%s6347_s17 + $0xa6] sm:$0xff] }
 0x12b   : > { %5441 = vmatprep.mubr.msk.f32.mxu1 %vm301_vm1, %v6995_v57  ;;  %5665 = vmatprep.mubr.msk.f32.mxu0 %vm301_vm1, %v3195_v40  ;;  %v4106_v57 = vld [vmem:[%s7559_s3 + $0x10] sm:$0xff]  ;;  %v4117_v20 = vld [vmem:[%s7559_s3 + $0x68] sm:$0xff] }
 0x12c   : > { %v5840_v40 = vpack.c.bf16 %v4117_v20, %v4116_v38 }
 0x12e   : > { %5442 = vmatmul.mubr.msk.f32.gmra.mrb[30].mxu1 %vm301_vm1, %v7006_v58  ;;  %5666 = vmatmul.mubr.msk.f32.gmra.mrb[30].mxu0 %vm301_vm1, %v3196_v21  ;;  %v4107_v58 = vld [vmem:[%s7559_s3 + $0x18] sm:$0xff]  ;;  %v4118_v21 = vld [vmem:[%s7559_s3 + $0x70] sm:$0xff] }
 0x12f   : > { %5444 = vmatprep.mubr.msk.f32.mxu1 %vm301_vm1, %v7009_v59  ;;  %5668 = vmatprep.mubr.msk.f32.mxu0 %vm301_vm1, %v3197_v23  ;;  %v3612_v59 = vld [vmem:[%s6347_s17 + $0xae] sm:$0xff]  ;;  %v5820_v60 = vpack.c.bf16 %v4107_v58, %v4106_v57  ;;  %v4119_v23 = vld [vmem:[%s7559_s3 + $0x78] sm:$0xff] }
 0x131   : > { %5821 = vmatprep.subr.bf16.mxu1 %v5820_v60 }
 0x132   : > { %5445 = vmatmul.mubr.msk.f32.gmra.mrb[32].mxu1 %vm301_vm1, %v7020_v61  ;;  %5669 = vmatmul.mubr.msk.f32.gmra.mrb[32].mxu0 %vm301_vm1, %v3198_v25  ;;  %v3613_v61 = vld [vmem:[%s6347_s17 + $0xb6] sm:$0xff]  ;;  %v5844_v25 = vpack.c.bf16 %v4119_v23, %v4118_v21  ;;  %s6183_s17 = sshll.u32 %s6244_s11, 4  ;;  %s6184_s17 = int_to_ptr.vmem [resolvable:$false] %s6183_s17 }
 0x133   : > { %5447 = vmatprep.mubr.msk.f32.mxu1 %vm301_vm1, %v1479_v26  ;;  %5671 = vmatprep.mubr.msk.f32.mxu0 %vm301_vm1, %v3199_v28  ;;  %s6185_s12 = scalar_lea.vmem %s6184_s17, 10496  ;;  %p6186_p0 = scmp.lt.s32.totalorder %s7508_s6, %s6184_s17 }
 0x134   : > { %5823 = vmatpush3.bf16.msra.mxu1 %v5820_v60  ;;  %p6187_p1 = scmp.lt.s32.totalorder %s6185_s12, %s6179_s10 }
 0x135   : > { %5825 = vmatprep.subr.bf16.mxu1 %v5824_v3 }
 0x136   : > { %5448 = vmatmul.mubr.msk.f32.gmra.mrb[34].mxu1 %vm301_vm1, %v1480_v30  ;;  %5672 = vmatmul.mubr.msk.f32.gmra.mrb[34].mxu0 %vm301_vm1, %v3200_v32  ;;  %p6188_p2 = por %p6187_p1, %p6186_p0 }
 0x137   : > { %5676 = vmatprep.mubr.msk.f32.mxu0 %vm301_vm1, %v3595_v33 }
 0x138   : > { %5827 = vmatpush3.bf16.msra.mxu1 %v5824_v3  ;;  %p6189_p3 = pnand %p6188_p2, %p6182_p13 }
 0x139   : > { %5829 = vmatprep.subr.bf16.mxu1 %v5828_v11 }
 0x13a   : > { %5677 = vmatmul.mubr.msk.f32.vlgmr.msra.gmra.mrb[0].mxu0 %vm301_vm1, %v3596_v35 }
 0x13b   : > { %5679 = vmatprep.mubr.msk.f32.mxu0 %vm301_vm1, %v3597_v37 }
 0x13c   : > { %5831 = vmatpush3.bf16.msra.mxu1 %v5828_v11 }
 0x13d   : > { %5833 = vmatprep.subr.bf16.mxu1 %v5832_v19 }
 0x13e   : > { %5680 = vmatmul.mubr.msk.f32.gmra.mrb[2].mxu0 %vm301_vm1, %v3598_v39 }
 0x13f   : > { %5682 = vmatprep.mubr.msk.f32.mxu0 %vm301_vm1, %v3599_v41 }
 0x140   : > { %5835 = vmatpush3.bf16.msra.mxu1 %v5832_v19 }
 0x141   : > { %5837 = vmatprep.subr.bf16.mxu1 %v5836_v36 }
 0x142   : > { %5683 = vmatmul.mubr.msk.f32.gmra.mrb[4].mxu0 %vm301_vm1, %v3600_v42 }
 0x143   : > { %5685 = vmatprep.mubr.msk.f32.mxu0 %vm301_vm1, %v3601_v43 }
 0x144   : > { %5839 = vmatpush3.bf16.msra.mxu1 %v5836_v36 }
 0x145   : > { %5841 = vmatprep.subr.bf16.mxu1 %v5840_v40 }
 0x146   : > { %5686 = vmatmul.mubr.msk.f32.gmra.mrb[6].mxu0 %vm301_vm1, %v3602_v44 }
 0x147   : > { %5688 = vmatprep.mubr.msk.f32.mxu0 %vm301_vm1, %v3603_v45 }
 0x148   : > { %5843 = vmatpush3.bf16.msra.mxu1 %v5840_v40 }
 0x149   : > { %5845 = vmatprep.subr.bf16.mxu1 %v5844_v25 }
 0x14a   : > { %5689 = vmatmul.mubr.msk.f32.gmra.mrb[8].mxu0 %vm301_vm1, %v3604_v46 }
 0x14b   : > { %5691 = vmatprep.mubr.msk.f32.mxu0 %vm301_vm1, %v3605_v47 }
 0x14c   : > { %5847 = vmatpush3.bf16.msra.mxu1 %v5844_v25 }
 0x14e   : > { %5692 = vmatmul.mubr.msk.f32.gmra.mrb[10].mxu0 %vm301_vm1, %v3606_v48 }
 0x14f   : > { %5694 = vmatprep.mubr.msk.f32.mxu0 %vm301_vm1, %v3607_v49 }
 0x152   : > { %5695 = vmatmul.mubr.msk.f32.gmra.mrb[12].mxu0 %vm301_vm1, %v3608_v53 }
 0x153   : > { %5697 = vmatprep.mubr.msk.f32.mxu0 %vm301_vm1, %v3609_v54 }
 0x156   : > { %5698 = vmatmul.mubr.msk.f32.gmra.mrb[14].mxu0 %vm301_vm1, %v3610_v55 }
 0x157   : > { %5700 = vmatprep.mubr.msk.f32.mxu0 %vm301_vm1, %v3611_v56 }
 0x15a   : > { %5701 = vmatmul.mubr.msk.f32.gmra.mrb[16].mxu0 %vm301_vm1, %v3612_v59 }
 0x15b   : > { %5703 = vmatprep.mubr.msk.f32.mxu0 %vm301_vm1, %v3613_v61 }
 0x15e   : > { %5704 = vmatmul.mubr.msk.f32.gmra.mrb[18].mxu0 %vm301_vm1, %v3614_v62 }
 0x15f   : > { %5706 = vmatprep.mubr.msk.f32.mxu0 %vm301_vm1, %v3615_v63 }
 0x162   : > { %5707 = vmatmul.mubr.msk.f32.gmra.mrb[20].mxu0 %vm301_vm1, %v3616_v2 }
 0x163   : > { %5709 = vmatprep.mubr.msk.f32.mxu0 %vm301_vm1, %v3617_v4 }
 0x166   : > { %5710 = vmatmul.mubr.msk.f32.gmra.mrb[22].mxu0 %vm301_vm1, %v3618_v5 }
 0x167   : > { %5712 = vmatprep.mubr.msk.f32.mxu0 %vm301_vm1, %v3619_v6  ;;  %v7351_v6 = vld [vmem:[%s7558_s2] ss:$0 sm:$0xff] }
 0x16a   : > { %5713 = vmatmul.mubr.msk.f32.gmra.mrb[24].mxu0 %vm301_vm1, %v3620_v9 }
 0x16b   : > { %5715 = vmatprep.mubr.msk.f32.mxu0 %vm301_vm1, %v3621_v12 }
 0x16e   : > { %5716 = vmatmul.mubr.msk.f32.gmra.mrb[26].mxu0 %vm301_vm1, %v3622_v13 }
 0x16f   : > { %5718 = vmatprep.mubr.msk.f32.mxu0 %vm301_vm1, %v3623_v14 }
 0x172   : > { %5719 = vmatmul.mubr.msk.f32.gmra.mrb[28].mxu0 %vm301_vm1, %v3624_v15 }
 0x173   : > { %5721 = vmatprep.mubr.msk.f32.mxu0 %vm301_vm1, %v3625_v16 }
 0x176   : > { %5722 = vmatmul.mubr.msk.f32.gmra.mrb[30].mxu0 %vm301_vm1, %v3626_v22 }
 0x177   : > { %5724 = vmatprep.mubr.msk.f32.mxu0 %vm301_vm1, %v3627_v24 }
 0x17a   : > { %5725 = vmatmul.mubr.msk.f32.gmra.mrb[32].mxu0 %vm301_vm1, %v3628_v10 }
 0x17b   : > { %5727 = vmatprep.mubr.msk.f32.mxu0 %vm301_vm1, %v3629_v27 }
 0x17e   : > { %5728 = vmatmul.mubr.msk.f32.gmra.mrb[34].mxu0 %vm301_vm1, %v3630_v34 }
 0x1c5   : > { %v5398_v26 = vpop.f32.mrb[0].mxu1 }
 0x1c6   : > { %v1660_v28 = vpop.f32.mrb[1].mxu1 }
 0x1c9   : > { %v5401_v30 = vpop.f32.mrb[2].mxu1 }
 0x1ca   : > { %v1670_v32 = vpop.f32.mrb[3].mxu1 }
 0x1cd   : > { %v5404_v33 = vpop.f32.mrb[4].mxu1 }
 0x1ce   : > { %v1680_v35 = vpop.f32.mrb[5].mxu1 }
 0x1d1   : > { %v5407_v37 = vpop.f32.mrb[6].mxu1 }
 0x1d2   : > { %v1690_v39 = vpop.f32.mrb[7].mxu1 }
 0x1d5   : > { %v7292_v41 = vpop.f32.mrb[8].mxu1 }
 0x1d6   : > { %v7294_v42 = vpop.f32.mrb[9].mxu1 }
 0x1d9   : > { %v7296_v43 = vpop.f32.mrb[10].mxu1 }
 0x1da   : > { %v7298_v44 = vpop.f32.mrb[11].mxu1 }
 0x1dd   : > { %v7300_v45 = vpop.f32.mrb[12].mxu1 }
 0x1de   : > { %v7302_v46 = vpop.f32.mrb[13].mxu1 }
 0x1e1   : > { %v7304_v47 = vpop.f32.mrb[14].mxu1 }
 0x1e2   : > { %v7306_v48 = vpop.f32.mrb[15].mxu1 }
 0x1e5   : > { %v7308_v49 = vpop.f32.mrb[16].mxu1 }
 0x1e6   : > { %v7310_v50 = vpop.f32.mrb[17].mxu1 }
 0x1e9   : > { %v7312_v51 = vpop.f32.mrb[18].mxu1 }
 0x1ea   : > { %v7314_v52 = vpop.f32.mrb[19].mxu1 }
 0x1ed   : > { %v7316_v53 = vpop.f32.mrb[20].mxu1 }
 0x1ee   : > { %v7318_v54 = vpop.f32.mrb[21].mxu1 }
 0x1f1   : > { %v7320_v55 = vpop.f32.mrb[22].mxu1 }
 0x1f2   : > { %v7322_v56 = vpop.f32.mrb[23].mxu1 }
 0x1f5   : > { %v7324_v57 = vpop.f32.mrb[24].mxu1 }
 0x1f6   : > { %v7326_v58 = vpop.f32.mrb[25].mxu1 }
 0x1f9   : > { %v7328_v59 = vpop.f32.mrb[26].mxu1 }
 0x1fa   : > { %v7330_v60 = vpop.f32.mrb[27].mxu1 }
 0x1fd   : > { %v7332_v61 = vpop.f32.mrb[28].mxu1 }
 0x1fe   : > { %v7334_v62 = vpop.f32.mrb[29].mxu1 }
 0x201   : > { %v7336_v63 = vpop.f32.mrb[30].mxu1 }
 0x202   : > { %v7338_v0 = vpop.f32.mrb[31].mxu1 }
 0x205   : > { %v7340_v1 = vpop.f32.mrb[32].mxu1 }
 0x206   : > { %v7342_v2 = vpop.f32.mrb[33].mxu1 }
 0x209   : > { %v7344_v3 = vpop.f32.mrb[34].mxu1 }
 0x20a   : > { %v7346_v4 = vpop.f32.mrb[35].mxu1 }
 0x20d   : > { %v5678_v5 = vpop.f32.mrb[0].mxu0 }
 0x20e   : > { %v5848_v7 = vadd.f32 %v5678_v5, %v5398_v26  ;;  %v3810_v8 = vpop.f32.mrb[1].mxu0 }
 0x20f   : > { %v5849_v9 = vadd.f32 %v3810_v8, %v1660_v28 }
 0x210   : > { %v4033_v11 = vadd.f32 %v5848_v7, %v7351_v6 }
 0x211   : > { %v4032_v12 = vadd.f32 %v5849_v9, %v7351_v6  ;;  %v5681_v13 = vpop.f32.mrb[2].mxu0 }
 0x212   : > { %v5850_v14 = vadd.f32 %v5681_v13, %v5401_v30  ;;  %v3820_v15 = vpop.f32.mrb[3].mxu0  ;;  %v4069_v18 = vmax.f32 %v4033_v11, 0.0 }
 0x213   : > { %v4068_v16 = vmax.f32 %v4032_v12, 0.0  ;;  %v5851_v17 = vadd.f32 %v3820_v15, %v1670_v32 }
 0x214   : > { %v4035_v19 = vadd.f32 %v5850_v14, %v7351_v6 }
 0x215   : > { %v4034_v22 = vadd.f32 %v5851_v17, %v7351_v6  ;;  %v5684_v24 = vpop.f32.mrb[4].mxu0  ;;  %5762 = vmatprep.mubr.f32.mxu1 %v4068_v16 }
 0x216   : > { %v5852_v10 = vadd.f32 %v5684_v24, %v5404_v33  ;;  %v3830_v27 = vpop.f32.mrb[5].mxu0  ;;  %5763 = vmatmul.mubr.f32.vlgmr.msra.gmra.mrb[36].mxu1 %v4069_v18  ;;  %v4071_v34 = vmax.f32 %v4035_v19, 0.0 }
 0x217   : > { %v4070_v29 = vmax.f32 %v4034_v22, 0.0  ;;  %v5853_v31 = vadd.f32 %v3830_v27, %v1680_v35 }
 0x218   : > { %v4037_v36 = vadd.f32 %v5852_v10, %v7351_v6 }
 0x219   : > { %v4036_v38 = vadd.f32 %v5853_v31, %v7351_v6  ;;  %v5687_v20 = vpop.f32.mrb[6].mxu0  ;;  %5765 = vmatprep.mubr.f32.mxu1 %v4070_v29 }
 0x21a   : > { %v5854_v40 = vadd.f32 %v5687_v20, %v5407_v37  ;;  %v3840_v21 = vpop.f32.mrb[7].mxu0  ;;  %5766 = vmatmul.mubr.f32.gmra.mrb[38].mxu1 %v4071_v34  ;;  %v4073_v26 = vmax.f32 %v4037_v36, 0.0 }
 0x21b   : > { %v4072_v23 = vmax.f32 %v4036_v38, 0.0  ;;  %v5855_v25 = vadd.f32 %v3840_v21, %v1690_v39 }
 0x21c   : > { %v4039_v28 = vadd.f32 %v5854_v40, %v7351_v6 }
 0x21d   : > { %v4038_v30 = vadd.f32 %v5855_v25, %v7351_v6  ;;  %v5690_v32 = vpop.f32.mrb[8].mxu0  ;;  %5768 = vmatprep.mubr.f32.mxu1 %v4072_v23 }
 0x21e   : > { %v5856_v33 = vadd.f32 %v5690_v32, %v7292_v41  ;;  %v3850_v35 = vpop.f32.mrb[9].mxu0  ;;  %5769 = vmatmul.mubr.f32.gmra.mrb[40].mxu1 %v4073_v26  ;;  %v4075_v8 = vmax.f32 %v4039_v28, 0.0 }
 0x21f   : > { %v4074_v5 = vmax.f32 %v4038_v30, 0.0  ;;  %v5857_v7 = vadd.f32 %v3850_v35, %v7294_v42 }
 0x220   : > { %v4041_v37 = vadd.f32 %v5856_v33, %v7351_v6 }
 0x221   : > { %v4040_v9 = vadd.f32 %v5857_v7, %v7351_v6  ;;  %v5693_v39 = vpop.f32.mrb[10].mxu0  ;;  %5771 = vmatprep.mubr.f32.mxu1 %v4074_v5 }
 0x222   : > { %v5858_v11 = vadd.f32 %v5693_v39, %v7296_v43  ;;  %v3860_v12 = vpop.f32.mrb[11].mxu0  ;;  %5772 = vmatmul.mubr.f32.gmra.mrb[42].mxu1 %v4075_v8  ;;  %v4077_v41 = vmax.f32 %v4041_v37, 0.0 }
 0x223   : > { %v4076_v13 = vmax.f32 %v4040_v9, 0.0  ;;  %v5859_v14 = vadd.f32 %v3860_v12, %v7298_v44 }
 0x224   : > { %v4043_v15 = vadd.f32 %v5858_v11, %v7351_v6 }
 0x225   : > { %v4042_v16 = vadd.f32 %v5859_v14, %v7351_v6  ;;  %v5696_v42 = vpop.f32.mrb[12].mxu0  ;;  %5774 = vmatprep.mubr.f32.mxu1 %v4076_v13 }
 0x226   : > { %v5860_v17 = vadd.f32 %v5696_v42, %v7300_v45  ;;  %v3870_v18 = vpop.f32.mrb[13].mxu0  ;;  %5775 = vmatmul.mubr.f32.gmra.mrb[44].mxu1 %v4077_v41  ;;  %v4079_v43 = vmax.f32 %v4043_v15, 0.0 }
 0x227   : > { %v4078_v19 = vmax.f32 %v4042_v16, 0.0  ;;  %v5861_v22 = vadd.f32 %v3870_v18, %v7302_v46 }
 0x228   : > { %v4045_v24 = vadd.f32 %v5860_v17, %v7351_v6 }
 0x229   : > { %v4044_v10 = vadd.f32 %v5861_v22, %v7351_v6  ;;  %v5699_v44 = vpop.f32.mrb[14].mxu0  ;;  %5777 = vmatprep.mubr.f32.mxu1 %v4078_v19 }
 0x22a   : > { %v5862_v27 = vadd.f32 %v5699_v44, %v7304_v47  ;;  %v3880_v29 = vpop.f32.mrb[15].mxu0  ;;  %5778 = vmatmul.mubr.f32.gmra.mrb[46].mxu1 %v4079_v43  ;;  %v4081_v45 = vmax.f32 %v4045_v24, 0.0 }
 0x22b   : > { %v4080_v31 = vmax.f32 %v4044_v10, 0.0  ;;  %v5863_v34 = vadd.f32 %v3880_v29, %v7306_v48 }
 0x22c   : > { %v4047_v36 = vadd.f32 %v5862_v27, %v7351_v6 }
 0x22d   : > { %v4046_v38 = vadd.f32 %v5863_v34, %v7351_v6  ;;  %v5702_v46 = vpop.f32.mrb[16].mxu0  ;;  %5780 = vmatprep.mubr.f32.mxu1 %v4080_v31 }
 0x22e   : > { %v5864_v20 = vadd.f32 %v5702_v46, %v7308_v49  ;;  %v3890_v40 = vpop.f32.mrb[17].mxu0  ;;  %5781 = vmatmul.mubr.f32.gmra.mrb[48].mxu1 %v4081_v45  ;;  %v4083_v47 = vmax.f32 %v4047_v36, 0.0 }
 0x22f   : > { %v4082_v21 = vmax.f32 %v4046_v38, 0.0  ;;  %v5865_v23 = vadd.f32 %v3890_v40, %v7310_v50 }
 0x230   : > { %v4049_v25 = vadd.f32 %v5864_v20, %v7351_v6 }
 0x231   : > { %v4048_v26 = vadd.f32 %v5865_v23, %v7351_v6  ;;  %v5705_v48 = vpop.f32.mrb[18].mxu0  ;;  %5783 = vmatprep.mubr.f32.mxu1 %v4082_v21 }
 0x232   : > { %v5866_v28 = vadd.f32 %v5705_v48, %v7312_v51  ;;  %v3900_v30 = vpop.f32.mrb[19].mxu0  ;;  %5784 = vmatmul.mubr.f32.gmra.mrb[50].mxu1 %v4083_v47  ;;  %v4085_v49 = vmax.f32 %v4049_v25, 0.0 }
 0x233   : > { %v4084_v32 = vmax.f32 %v4048_v26, 0.0  ;;  %v5867_v33 = vadd.f32 %v3900_v30, %v7314_v52 }
 0x234   : > { %v4051_v35 = vadd.f32 %v5866_v28, %v7351_v6 }
 0x235   : > { %v4050_v5 = vadd.f32 %v5867_v33, %v7351_v6  ;;  %v5708_v50 = vpop.f32.mrb[20].mxu0  ;;  %5786 = vmatprep.mubr.f32.mxu1 %v4084_v32 }
 0x236   : > { %v5868_v7 = vadd.f32 %v5708_v50, %v7316_v53  ;;  %v3910_v8 = vpop.f32.mrb[21].mxu0  ;;  %5787 = vmatmul.mubr.f32.gmra.mrb[52].mxu1 %v4085_v49  ;;  %v4087_v51 = vmax.f32 %v4051_v35, 0.0 }
 0x237   : > { %v4086_v37 = vmax.f32 %v4050_v5, 0.0  ;;  %v5869_v9 = vadd.f32 %v3910_v8, %v7318_v54 }
 0x238   : > { %v4053_v39 = vadd.f32 %v5868_v7, %v7351_v6 }
 0x239   : > { %v4052_v11 = vadd.f32 %v5869_v9, %v7351_v6  ;;  %v5711_v52 = vpop.f32.mrb[22].mxu0  ;;  %5789 = vmatprep.mubr.f32.mxu1 %v4086_v37 }
 0x23a   : > { %v5870_v12 = vadd.f32 %v5711_v52, %v7320_v55  ;;  %v3920_v13 = vpop.f32.mrb[23].mxu0  ;;  %5790 = vmatmul.mubr.f32.gmra.mrb[54].mxu1 %v4087_v51  ;;  %v4089_v53 = vmax.f32 %v4053_v39, 0.0 }
 0x23b   : > { %v4088_v14 = vmax.f32 %v4052_v11, 0.0  ;;  %v5871_v41 = vadd.f32 %v3920_v13, %v7322_v56 }
 0x23c   : > { %v4055_v15 = vadd.f32 %v5870_v12, %v7351_v6 }
 0x23d   : > { %v4054_v16 = vadd.f32 %v5871_v41, %v7351_v6  ;;  %v5714_v54 = vpop.f32.mrb[24].mxu0  ;;  %5792 = vmatprep.mubr.f32.mxu1 %v4088_v14 }
 0x23e   : > { %v5872_v42 = vadd.f32 %v5714_v54, %v7324_v57  ;;  %v3930_v17 = vpop.f32.mrb[25].mxu0  ;;  %5793 = vmatmul.mubr.f32.gmra.mrb[56].mxu1 %v4089_v53  ;;  %v4091_v55 = vmax.f32 %v4055_v15, 0.0 }
 0x23f   : > { %v4090_v18 = vmax.f32 %v4054_v16, 0.0  ;;  %v5873_v19 = vadd.f32 %v3930_v17, %v7326_v58 }
 0x240   : > { %v4057_v22 = vadd.f32 %v5872_v42, %v7351_v6 }
 0x241   : > { %v4056_v43 = vadd.f32 %v5873_v19, %v7351_v6  ;;  %v5717_v56 = vpop.f32.mrb[26].mxu0  ;;  %5795 = vmatprep.mubr.f32.mxu1 %v4090_v18 }
 0x242   : > { %v5874_v24 = vadd.f32 %v5717_v56, %v7328_v59  ;;  %v3940_v10 = vpop.f32.mrb[27].mxu0  ;;  %5796 = vmatmul.mubr.f32.gmra.mrb[58].mxu1 %v4091_v55  ;;  %v4093_v57 = vmax.f32 %v4057_v22, 0.0 }
 0x243   : > { %v4092_v44 = vmax.f32 %v4056_v43, 0.0  ;;  %v5875_v27 = vadd.f32 %v3940_v10, %v7330_v60 }
 0x244   : > { %v4059_v29 = vadd.f32 %v5874_v24, %v7351_v6 }
 0x245   : > { %v4058_v31 = vadd.f32 %v5875_v27, %v7351_v6  ;;  %v5720_v58 = vpop.f32.mrb[28].mxu0  ;;  %5798 = vmatprep.mubr.f32.mxu1 %v4092_v44 }
 0x246   : > { %v5876_v34 = vadd.f32 %v5720_v58, %v7332_v61  ;;  %v3950_v45 = vpop.f32.mrb[29].mxu0  ;;  %5799 = vmatmul.mubr.f32.gmra.mrb[60].mxu1 %v4093_v57  ;;  %v4095_v59 = vmax.f32 %v4059_v29, 0.0 }
 0x247   : > { %v4094_v36 = vmax.f32 %v4058_v31, 0.0  ;;  %v5877_v38 = vadd.f32 %v3950_v45, %v7334_v62 }
 0x248   : > { %v4061_v46 = vadd.f32 %v5876_v34, %v7351_v6 }
 0x249   : > { %v4060_v20 = vadd.f32 %v5877_v38, %v7351_v6  ;;  %v5723_v60 = vpop.f32.mrb[30].mxu0  ;;  %5801 = vmatprep.mubr.f32.mxu1 %v4094_v36 }
 0x24a   : > { %v5878_v40 = vadd.f32 %v5723_v60, %v7336_v63  ;;  %v3960_v21 = vpop.f32.mrb[31].mxu0  ;;  %5802 = vmatmul.mubr.f32.gmra.mrb[62].mxu1 %v4095_v59  ;;  %v4097_v61 = vmax.f32 %v4061_v46, 0.0 }
 0x24b   : > { %v4096_v23 = vmax.f32 %v4060_v20, 0.0  ;;  %v5879_v47 = vadd.f32 %v3960_v21, %v7338_v0 }
 0x24c   : > { %v4063_v25 = vadd.f32 %v5878_v40, %v7351_v6 }
 0x24d   : > { %v4062_v26 = vadd.f32 %v5879_v47, %v7351_v6  ;;  %v5726_v62 = vpop.f32.mrb[32].mxu0  ;;  %5804 = vmatprep.mubr.f32.mxu1 %v4096_v23 }
 0x24e   : > { %v5880_v48 = vadd.f32 %v5726_v62, %v7340_v1  ;;  %v3970_v28 = vpop.f32.mrb[33].mxu0  ;;  %5805 = vmatmul.mubr.f32.gmra.mrb[64].mxu1 %v4097_v61  ;;  %v4099_v63 = vmax.f32 %v4063_v25, 0.0 }
 0x24f   : > { %v4098_v30 = vmax.f32 %v4062_v26, 0.0  ;;  %v5881_v32 = vadd.f32 %v3970_v28, %v7342_v2 }
 0x250   : > { %v4065_v33 = vadd.f32 %v5880_v48, %v7351_v6 }
 0x251   : > { %v4064_v49 = vadd.f32 %v5881_v32, %v7351_v6  ;;  %v5729_v0 = vpop.f32.mrb[34].mxu0  ;;  %5807 = vmatprep.mubr.f32.mxu1 %v4098_v30 }
 0x252   : > { %v5882_v35 = vadd.f32 %v5729_v0, %v7344_v3  ;;  %v3980_v5 = vpop.f32.mrb[35].mxu0  ;;  %5808 = vmatmul.mubr.f32.gmra.mrb[66].mxu1 %v4099_v63  ;;  %v4101_v7 = vmax.f32 %v4065_v33, 0.0  ;;  %v6243_v3 = vmov 0.0  }
 0x253   : > { %v4100_v50 = vmax.f32 %v4064_v49, 0.0  ;;  %v5883_v1 = vadd.f32 %v3980_v5, %v7346_v4  ;;  %4408 = vst [vmem:[%s7420_s23 + $0x120] sm:$0xff] %v6243_v3  ;;  %4409 = vst [vmem:[%s7420_s23 + $0x128] sm:$0xff] %v6243_v3  ;;  %v7430_v4 = vld [vmem:[%s7560_s4] ss:$0 sm:$0xff] }
 0x254   : > { %v4067_v8 = vadd.f32 %v5882_v35, %v7351_v6  ;;  %4410 = vst [vmem:[%s7420_s23 + $0x130] sm:$0xff] %v6243_v3  ;;  %4411 = vst [vmem:[%s7420_s23 + $0x138] sm:$0xff] %v6243_v3 }
 0x255   : > { %v4066_v2 = vadd.f32 %v5883_v1, %v7351_v6  ;;  %5810 = vmatprep.mubr.f32.mxu1 %v4100_v50  ;;  %4412 = vst [vmem:[%s7420_s23 + $0x140] sm:$0xff] %v6243_v3 }
 0x256   : > { %5811 = vmatmul.mubr.f32.gmra.mrb[68].mxu1 %v4101_v7  ;;  %v4103_v9 = vmax.f32 %v4067_v8, 0.0 }
 0x257   : > { %v4102_v37 = vmax.f32 %v4066_v2, 0.0 }
 0x259   : > { %5813 = vmatprep.mubr.f32.mxu1 %v4102_v37 }
 0x25a   : > { %5814 = vmatmul.mubr.f32.gmra.mrb[70].mxu1 %v4103_v9 }
 0x2e9   : > { %v5764_v6 = vpop.f32.mrb[36].mxu1 }
 0x2ea   : > { %v4199_v51 = vadd.f32 %v5764_v6, %v7430_v4  ;;  %v4193_v39 = vpop.f32.mrb[37].mxu1 }
 0x2eb   : > { %v4194_v11 = vadd.f32 %v7430_v4, %v4193_v39 }
 0x2ec   : > { %4373 = vst [vmem:[%s7420_s23 + $0x8] sm:$0xff] %v4199_v51 }
 0x2ed   : > { %4372 = vst [vmem:[%s7420_s23] sm:$0xff] %v4194_v11  ;;  %v5767_v52 = vpop.f32.mrb[38].mxu1 }
 0x2ee   : > { %v4209_v12 = vadd.f32 %v5767_v52, %v7430_v4  ;;  %v4203_v13 = vpop.f32.mrb[39].mxu1 }
 0x2ef   : > { %v4204_v14 = vadd.f32 %v7430_v4, %v4203_v13 }
 0x2f0   : > { %4375 = vst [vmem:[%s7420_s23 + $0x18] sm:$0xff] %v4209_v12 }
 0x2f1   : > { %4374 = vst [vmem:[%s7420_s23 + $0x10] sm:$0xff] %v4204_v14  ;;  %v5770_v41 = vpop.f32.mrb[40].mxu1 }
 0x2f2   : > { %v4219_v53 = vadd.f32 %v5770_v41, %v7430_v4  ;;  %v4213_v15 = vpop.f32.mrb[41].mxu1 }
 0x2f3   : > { %v4214_v16 = vadd.f32 %v7430_v4, %v4213_v15 }
 0x2f4   : > { %4377 = vst [vmem:[%s7420_s23 + $0x28] sm:$0xff] %v4219_v53 }
 0x2f5   : > { %4376 = vst [vmem:[%s7420_s23 + $0x20] sm:$0xff] %v4214_v16  ;;  %v5773_v54 = vpop.f32.mrb[42].mxu1 }
 0x2f6   : > { %v4229_v42 = vadd.f32 %v5773_v54, %v7430_v4  ;;  %v4223_v17 = vpop.f32.mrb[43].mxu1 }
 0x2f7   : > { %v4224_v18 = vadd.f32 %v7430_v4, %v4223_v17 }
 0x2f8   : > { %4379 = vst [vmem:[%s7420_s23 + $0x38] sm:$0xff] %v4229_v42 }
 0x2f9   : > { %4378 = vst [vmem:[%s7420_s23 + $0x30] sm:$0xff] %v4224_v18  ;;  %v5776_v19 = vpop.f32.mrb[44].mxu1 }
 0x2fa   : > { %v4239_v55 = vadd.f32 %v5776_v19, %v7430_v4  ;;  %v4233_v22 = vpop.f32.mrb[45].mxu1 }
 0x2fb   : > { %v4234_v43 = vadd.f32 %v7430_v4, %v4233_v22 }
 0x2fc   : > { %4381 = vst [vmem:[%s7420_s23 + $0x48] sm:$0xff] %v4239_v55 }
 0x2fd   : > { %4380 = vst [vmem:[%s7420_s23 + $0x40] sm:$0xff] %v4234_v43  ;;  %v5779_v56 = vpop.f32.mrb[46].mxu1 }
 0x2fe   : > { %v4249_v24 = vadd.f32 %v5779_v56, %v7430_v4  ;;  %v4243_v10 = vpop.f32.mrb[47].mxu1 }
 0x2ff   : > { %v4244_v44 = vadd.f32 %v7430_v4, %v4243_v10 }
 0x300   : > { %4383 = vst [vmem:[%s7420_s23 + $0x58] sm:$0xff] %v4249_v24 }
 0x301   : > { %4382 = vst [vmem:[%s7420_s23 + $0x50] sm:$0xff] %v4244_v44  ;;  %v5782_v27 = vpop.f32.mrb[48].mxu1 }
 0x302   : > { %v4259_v57 = vadd.f32 %v5782_v27, %v7430_v4  ;;  %v4253_v29 = vpop.f32.mrb[49].mxu1 }
 0x303   : > { %v4254_v31 = vadd.f32 %v7430_v4, %v4253_v29 }
 0x304   : > { %4385 = vst [vmem:[%s7420_s23 + $0x68] sm:$0xff] %v4259_v57 }
 0x305   : > { %4384 = vst [vmem:[%s7420_s23 + $0x60] sm:$0xff] %v4254_v31  ;;  %v5785_v58 = vpop.f32.mrb[50].mxu1 }
 0x306   : > { %v4269_v34 = vadd.f32 %v5785_v58, %v7430_v4  ;;  %v4263_v45 = vpop.f32.mrb[51].mxu1 }
 0x307   : > { %v4264_v36 = vadd.f32 %v7430_v4, %v4263_v45 }
 0x308   : > { %4387 = vst [vmem:[%s7420_s23 + $0x78] sm:$0xff] %v4269_v34 }
 0x309   : > { %4386 = vst [vmem:[%s7420_s23 + $0x70] sm:$0xff] %v4264_v36  ;;  %v5788_v38 = vpop.f32.mrb[52].mxu1 }
 0x30a   : > { %v4279_v59 = vadd.f32 %v5788_v38, %v7430_v4  ;;  %v4273_v46 = vpop.f32.mrb[53].mxu1 }
 0x30b   : > { %v4274_v20 = vadd.f32 %v7430_v4, %v4273_v46 }
 0x30c   : > { %4389 = vst [vmem:[%s7420_s23 + $0x88] sm:$0xff] %v4279_v59 }
 0x30d   : > { %4388 = vst [vmem:[%s7420_s23 + $0x80] sm:$0xff] %v4274_v20  ;;  %v5791_v60 = vpop.f32.mrb[54].mxu1 }
 0x30e   : > { %v4289_v40 = vadd.f32 %v5791_v60, %v7430_v4  ;;  %v4283_v21 = vpop.f32.mrb[55].mxu1 }
 0x30f   : > { %v4284_v23 = vadd.f32 %v7430_v4, %v4283_v21 }
 0x310   : > { %4391 = vst [vmem:[%s7420_s23 + $0x98] sm:$0xff] %v4289_v40 }
 0x311   : > { %4390 = vst [vmem:[%s7420_s23 + $0x90] sm:$0xff] %v4284_v23  ;;  %v5794_v47 = vpop.f32.mrb[56].mxu1 }
 0x312   : > { %v4299_v61 = vadd.f32 %v5794_v47, %v7430_v4  ;;  %v4293_v25 = vpop.f32.mrb[57].mxu1 }
 0x313   : > { %v4294_v26 = vadd.f32 %v7430_v4, %v4293_v25 }
 0x314   : > { %4393 = vst [vmem:[%s7420_s23 + $0xa8] sm:$0xff] %v4299_v61 }
 0x315   : > { %4392 = vst [vmem:[%s7420_s23 + $0xa0] sm:$0xff] %v4294_v26  ;;  %v5797_v62 = vpop.f32.mrb[58].mxu1 }
 0x316   : > { %v4309_v48 = vadd.f32 %v5797_v62, %v7430_v4  ;;  %v4303_v28 = vpop.f32.mrb[59].mxu1 }
 0x317   : > { %v4304_v30 = vadd.f32 %v7430_v4, %v4303_v28 }
 0x318   : > { %4395 = vst [vmem:[%s7420_s23 + $0xb8] sm:$0xff] %v4309_v48 }
 0x319   : > { %4394 = vst [vmem:[%s7420_s23 + $0xb0] sm:$0xff] %v4304_v30  ;;  %v5800_v32 = vpop.f32.mrb[60].mxu1 }
 0x31a   : > { %v4319_v63 = vadd.f32 %v5800_v32, %v7430_v4  ;;  %v4313_v33 = vpop.f32.mrb[61].mxu1 }
 0x31b   : > { %v4314_v49 = vadd.f32 %v7430_v4, %v4313_v33 }
 0x31c   : > { %4397 = vst [vmem:[%s7420_s23 + $0xc8] sm:$0xff] %v4319_v63 }
 0x31d   : > { %4396 = vst [vmem:[%s7420_s23 + $0xc0] sm:$0xff] %v4314_v49  ;;  %v5803_v0 = vpop.f32.mrb[62].mxu1 }
 0x31e   : > { %v4329_v35 = vadd.f32 %v5803_v0, %v7430_v4  ;;  %v4323_v5 = vpop.f32.mrb[63].mxu1 }
 0x31f   : > { %v4324_v50 = vadd.f32 %v7430_v4, %v4323_v5 }
 0x320   : > { %4399 = vst [vmem:[%s7420_s23 + $0xd8] sm:$0xff] %v4329_v35 }
 0x321   : > { %4398 = vst [vmem:[%s7420_s23 + $0xd0] sm:$0xff] %v4324_v50  ;;  %v5806_v1 = vpop.f32.mrb[64].mxu1 }
 0x322   : > { %v4339_v7 = vadd.f32 %v5806_v1, %v7430_v4  ;;  %v4333_v8 = vpop.f32.mrb[65].mxu1 }
 0x323   : > { %v4334_v2 = vadd.f32 %v7430_v4, %v4333_v8 }
 0x324   : > { %4401 = vst [vmem:[%s7420_s23 + $0xe8] sm:$0xff] %v4339_v7 }
 0x325   : > { %4400 = vst [vmem:[%s7420_s23 + $0xe0] sm:$0xff] %v4334_v2  ;;  %v5809_v37 = vpop.f32.mrb[66].mxu1 }
 0x326   : > { %v4349_v9 = vadd.f32 %v5809_v37, %v7430_v4  ;;  %v4343_v3 = vpop.f32.mrb[67].mxu1 }
 0x327   : > { %v4344_v6 = vadd.f32 %v7430_v4, %v4343_v3 }
 0x328   : > { %4403 = vst [vmem:[%s7420_s23 + $0xf8] sm:$0xff] %v4349_v9 }
 0x329   : > { %4402 = vst [vmem:[%s7420_s23 + $0xf0] sm:$0xff] %v4344_v6  ;;  %v5812_v51 = vpop.f32.mrb[68].mxu1 }
 0x32a   : > { %v4359_v39 = vadd.f32 %v5812_v51, %v7430_v4  ;;  %v4353_v11 = vpop.f32.mrb[69].mxu1 }
 0x32b   : > { %v4354_v52 = vadd.f32 %v7430_v4, %v4353_v11 }
 0x32c   : > { %4405 = vst [vmem:[%s7420_s23 + $0x108] sm:$0xff] %v4359_v39 }
 0x32d   : > { %4404 = vst [vmem:[%s7420_s23 + $0x100] sm:$0xff] %v4354_v52  ;;  %v5815_v12 = vpop.f32.mrb[70].mxu1 }
 0x32e   : > { %v4369_v13 = vadd.f32 %v5815_v12, %v7430_v4  ;;  %v4363_v14 = vpop.f32.mrb[71].mxu1 }
 0x32f   : > { %v4364_v41 = vadd.f32 %v7430_v4, %v4363_v14 }
 0x330   : > { %4407 = vst [vmem:[%s7420_s23 + $0x118] sm:$0xff] %v4369_v13 }
 0x331   : > { %4406 = vst [vmem:[%s7420_s23 + $0x110] sm:$0xff] %v4364_v41 }
 0x332   : > { %6192 = shalt.err (!%p6189_p3)
}
 0x333   : > { %s6193_s13 = scalar_lea.hbm %s7506_s9, 5248  ;;  %s6197_s16 = scalar_lea.hbm %s7561_s5, 10496 }
 0x334   : > { %p6194_p4 = scmp.ne.s32.totalorder %s7506_s9, %s6193_s13  ;;  %p6198_p9 = scmp.lt.u32.totalorder %s7506_s9, %s7561_s5 }
 0x335   : > { %p6199_p10 = scmp.lt.u32.totalorder %s6197_s16, %s6193_s13  ;;  %p6201_p12 = scmp.lt.u32.totalorder %s6193_s13, %s7506_s9 }
 0x336   : > { %p6195_p7 = pnand %p6194_p4, %p6315_p5 }
 0x337   : > { %p6200_p11 = por %p6199_p10, %p6198_p9 }
 0x338   : > { %p6196_p8 = pneg %p6195_p7 }
 0x339   : > { %p6202_p13 = por %p6201_p12, %p6200_p11 }
 0x33b   : > { %p6203_p0 = pnand %p6202_p13, %p6196_p8 }
 0x33d   : > { %6206 = shalt.err (!%p6203_p0)
}
 0x33e   : > { %s6245_s26 = smov 128   ;;  %s6246_s30 = smov 8  }
 0x33f   : > { %6137 = dma.vmem_to_hbm [thread:$0]  (%p6315_p5), %s7508_s6, 5248, %s7506_s9, %s7515_s22, %s6245_s26, %s6245_s26, %s6246_s30  }
 0x340 PF: > { %p6143_p1 = scmp.ge.s32.totalorder %s6241_s21, 2  ;;  %s4442_s7 = sand.u32 1, %s6229_s18  }
 0x341   : > { %s4443_s8 = scalar_lea.sflag [#allocation3], %s4442_s7 }
 0x342   : > { %p6140_p2 = pnand %p6143_p1, %p6319_p6 }
 0x344   : > { %6224 = dma.done.wait (!%p6140_p2), %s4443_s8, 5248  }
 0x345   : > { %6226 = vsyncadd (!%p6140_p2), %s4443_s8, 4294962048  ;;  %p15_p3 = scmp.ge.s32.totalorder %s6302_s24, 4   ;;  %s7564_s18 = smov %s6233_s19 }
 0x346   : > { %s7565_s19 = smov %s6237_s20  ;;  %s7566_s20 = smov %s6313_s27 }
 0x347   : > { %s7567_s21 = smov %s6302_s24  ;;  %17 = sbr.rel (!%p15_p3) target bundleno = 3 (0x3), region = 83 }
 0x34e   :  { %4448 = vsyncpa [#allocation3], 1 }
 0x34f   :  { %4450 = vsyncpa [#allocation3 + $0x1], 1 }

</bundles_post_ra>
